<compile_context>
chip_gen: v5e
topology: v5e:2x2
jax: 0.10.0
libtpu: 0.0.40
codegen_flags: <defaults>
</compile_context>

<pallas_src>
import functools

import numpy as np
import jax
import jax.numpy as jnp
from jax.experimental import pallas as pl
from jax.experimental.pallas import tpu as pltpu

EPS = 1e-5
TAPS = [(dy, dx) for dy in (-1, 0, 1) for dx in (-1, 0, 1)]


# ------------------------------ fused forward ------------------------------

def res_model_forward(x_nchw, params, *, H, W):
    N, Cin = x_nchw.shape[0], x_nchw.shape[1]
    F = params["g_start"].shape[0]           # number_of_filters
    C8 = params["w_flat"].shape[0]           # Conv Flat output channels (8)
    HW = H * W
    NP = N * HW
    n_res = len(params["res_blocks"])
    L = 1 + 2 * n_res                        # number of 3x3 convs

    # ---- one-time glue: pack params into kernel-friendly layouts ----
    def pack(w9):
        # (9, Cout, Cin) -> (Cout, 9*Cin) so the 9 taps stack on the
        # contraction axis (no in-kernel transpose needed).
        return jnp.transpose(w9, (1, 0, 2)).reshape(F, 9 * F)

    w0 = jnp.pad(params["w_start"], ((0, 0), (0, 0), (0, F - Cin)))  # (9,F,F)
    ws = [pack(w0)]
    gs, bes = [params["g_start"]], [params["be_start"]]
    for blk in params["res_blocks"]:
        ws += [pack(blk["w1"]), pack(blk["w2"])]
        gs += [blk["g1"], blk["g2"]]
        bes += [blk["be1"], blk["be2"]]
    cw = jnp.stack(ws)                        # (L, F, 9F)
    gg = jnp.stack(gs).reshape(L, F, 1)       # (L, F, 1)
    bb = jnp.stack(bes).reshape(L, F, 1)
    # NOTE: 3x3-conv biases intentionally not packed (cancelled by BN mean).
    fw = params["w_flat"]                     # (C8, F)
    fb = params["b_flat"].reshape(C8, 1)      # (C8, 1)
    wo = params["w_out"]                      # (C8, HW)  NCHW flatten folded in
    bo = params["b_out"].reshape(1, 1)        # (1, 1) scalar -> SMEM

    # Boundary-validity masks for the 9 taps; pattern repeats every H*W, so
    # only (9, 1, HW) is DMA'd and it is tiled across N inside the kernel.
    pos = np.arange(HW)
    hh, ww = pos // W, pos % W
    masks_np = np.zeros((9, 1, HW), np.float32)
    for t, (dy, dx) in enumerate(TAPS):
        masks_np[t, 0, :] = ((hh + dy >= 0) & (hh + dy < H)
                             & (ww + dx >= 0) & (ww + dx < W))
    masks = jnp.asarray(masks_np)             # (9, 1, HW)

    # Input NCHW -> channels-first flat (F, N*H*W); pad channels up to F.
    x = jnp.transpose(x_nchw, (1, 0, 2, 3)).reshape(Cin, NP).astype(jnp.float32)
    x = jnp.pad(x, ((0, F - Cin), (0, 0)))    # (F, NP)

    # --------------------------- fused kernel ---------------------------
    def kernel(x_ref, m_ref, cw_ref, g_ref, be_ref, fw_ref, fb_ref,
               wo_ref, bo_ref, o_ref):
        # Tap masks tiled once across the batch (validity repeats every HW).
        msk = [jnp.concatenate([m_ref[t]] * N, axis=1) for t in range(9)]

        def conv3x3(a, w_l):
            # a: (F, NP) in (channel, n*H*W + h*W + w) layout; w_l: (F, 9F).
            # Circular lane shift (XLU) + boundary mask per tap; wrapped
            # lanes land only on masked-out positions, so this is exact.
            taps = []
            for t, (dy, dx) in enumerate(TAPS):
                s = dy * W + dx
                if s == 0:
                    taps.append(a)
                else:
                    taps.append(pltpu.roll(a, shift=(-s) % NP, axis=1) * msk[t])
            stacked = jnp.concatenate(taps, axis=0)          # (9F, NP)
            return jnp.dot(w_l, stacked,
                           preferred_element_type=jnp.float32)   # one MXU matmul

        def bn(y, g, be):
            # Training-mode BN with de-serialized statistics (two
            # independent lane reductions; var = E[y^2] - mean^2).
            s1 = jnp.sum(y, axis=1, keepdims=True)
            s2 = jnp.sum(y * y, axis=1, keepdims=True)
            mean = s1 * (1.0 / NP)
            var = s2 * (1.0 / NP) - mean * mean
            return (y - mean) * jax.lax.rsqrt(var + EPS) * g + be

        relu = lambda v: jnp.maximum(v, 0.0)

        # Conv Start + BN + ReLU
        y = relu(bn(conv3x3(x_ref[...], cw_ref[0]), g_ref[0], be_ref[0]))

        # Residual blocks (rolled loop; dynamic layer index into stacked refs)
        def res_body(r, yc):
            l1 = 1 + 2 * r
            l2 = l1 + 1
            ident = yc
            h = relu(bn(conv3x3(yc, cw_ref[l1]), g_ref[l1], be_ref[l1]))
            h = bn(conv3x3(h, cw_ref[l2]), g_ref[l2], be_ref[l2])
            return relu(h + ident)

        y = jax.lax.fori_loop(0, n_res, res_body, y)

        # Conv Flat (1x1 conv == channel-mixing matmul)
        z = jnp.dot(fw_ref[...], y,
                    preferred_element_type=jnp.float32) + fb_ref[...]   # (C8, NP)

        # Flatten (NCHW order folded into w_out) + output Linear:
        # per-sample 128-aligned lane slices, no tiled weight / one-hot matrix.
        wo_v = wo_ref[...]                                   # (C8, HW)
        parts = []
        for n in range(N):
            zn = z[:, n * HW:(n + 1) * HW] * wo_v            # (C8, HW)
            sn = jnp.sum(jnp.sum(zn, axis=1, keepdims=True),
                         axis=0, keepdims=True)              # (1, 1)
            parts.append(sn)
        o_ref[...] = jnp.concatenate(parts, axis=0) + bo_ref[0, 0]   # (N, 1)

    vmem = pl.BlockSpec(memory_space=pltpu.MemorySpace.VMEM)
    smem = pl.BlockSpec(memory_space=pltpu.MemorySpace.SMEM)
    return pl.pallas_call(
        kernel,
        out_shape=jax.ShapeDtypeStruct((N, 1), jnp.float32),
        in_specs=[vmem, vmem, vmem, vmem, vmem, vmem, vmem, vmem, smem],
        out_specs=vmem,
    )(x, masks, cw, gg, bb, fw, fb, wo, bo)


# -------------------- deterministic parameter init ------------------------

def init_params(key, num_layers, num_res, nfilters, H, W):
    n_conv = 1 + 2 * num_res
    keys = iter(jax.random.split(key, 4 * n_conv + 6))

    def nrm(shape, scale):
        return scale * jax.random.normal(next(keys), shape, jnp.float32)

    p = {}
    # 3x3 conv weights stored as (9, Cout, Cin), tap index t = (dy+1)*3+(dx+1).
    p["w_start"] = nrm((9, nfilters, num_layers), 1.0 / (9 * num_layers) ** 0.5)
    p["b_start"] = nrm((nfilters,), 0.1)
    p["g_start"] = 1.0 + nrm((nfilters,), 0.1)
    p["be_start"] = nrm((nfilters,), 0.1)

    s = 1.0 / (9 * nfilters) ** 0.5
    p["res_blocks"] = []
    for _ in range(num_res):
        blk = {
            "w1": nrm((9, nfilters, nfilters), s), "b1": nrm((nfilters,), 0.1),
            "g1": 1.0 + nrm((nfilters,), 0.1), "be1": nrm((nfilters,), 0.1),
            "w2": nrm((9, nfilters, nfilters), s), "b2": nrm((nfilters,), 0.1),
            "g2": 1.0 + nrm((nfilters,), 0.1), "be2": nrm((nfilters,), 0.1),
        }
        p["res_blocks"].append(blk)

    p["w_flat"] = nrm((8, nfilters), 1.0 / nfilters ** 0.5)
    p["b_flat"] = nrm((8,), 0.1)
    # Output Linear weight with the NCHW flatten permutation folded in:
    # w_out[c, h*W + w] <-> PyTorch Linear weight column c*H*W + h*W + w.
    p["w_out"] = nrm((8, H * W), 1.0 / (8 * H * W) ** 0.5)
    p["b_out"] = nrm((1,), 0.1)
    return p


# --------------------------- pure-JAX reference ----------------------------

def ref_forward(x_nchw, p, *, H, W):
    x = jnp.transpose(x_nchw, (0, 2, 3, 1)).astype(jnp.float32)   # NHWC

    def conv(x, w9, b):
        cout, cin = w9.shape[1], w9.shape[2]
        w_hwio = jnp.transpose(w9.reshape(3, 3, cout, cin), (0, 1, 3, 2))
        y = jax.lax.conv_general_dilated(
            x, w_hwio, window_strides=(1, 1), padding=((1, 1), (1, 1)),
            dimension_numbers=("NHWC", "HWIO", "NHWC"))
        return y + b

    def bn(y, g, be):
        m = jnp.mean(y, axis=(0, 1, 2), keepdims=True)
        v = jnp.mean((y - m) ** 2, axis=(0, 1, 2), keepdims=True)
        return (y - m) * jax.lax.rsqrt(v + EPS) * g + be

    y = jax.nn.relu(bn(conv(x, p["w_start"], p["b_start"]),
                       p["g_start"], p["be_start"]))
    for blk in p["res_blocks"]:
        ident = y
        h = jax.nn.relu(bn(conv(y, blk["w1"], blk["b1"]), blk["g1"], blk["be1"]))
        h = bn(conv(h, blk["w2"], blk["b2"]), blk["g2"], blk["be2"])
        y = jax.nn.relu(h + ident)
    z = jnp.einsum("nhwc,dc->nhwd", y, p["w_flat"]) + p["b_flat"]
    out = jnp.einsum("nhwd,dhw->n", z, p["w_out"].reshape(8, H, W))[:, None]
    return out + p["b_out"]


# ---------------------------------- main -----------------------------------

if __name__ == "__main__":
    # ResModel(input_shape=(16,16), num_layers=4, num_of_res_layers=2,
    #          number_of_filters=8)
    H, W = 16, 16
    num_layers = 4          # input channels
    num_res = 2
    nfilters = 8
    N = 2

    key = jax.random.PRNGKey(0)
    k_x, k_p = jax.random.split(key)
    x = jax.random.normal(k_x, (N, num_layers, H, W), jnp.float32)
    params = init_params(k_p, num_layers, num_res, nfilters, H, W)

    fwd = jax.jit(functools.partial(res_model_forward, H=H, W=W))
    out = jax.block_until_ready(fwd(x, params))

    assert out.shape == (N, 1), out.shape
    ref = ref_forward(x, params, H=H, W=W)
    assert jnp.allclose(out, ref, atol=2e-2, rtol=2e-2), (out, ref)

    print("KERNEL_OK")
</pallas_src>

<mosaic_0001>
module attributes {stable_mosaic.version = 11 : i64} {
  func.func @kernel(%arg0: memref<8x512xf32, #tpu.memory_space<vmem>>, %arg1: memref<9x1x256xf32, #tpu.memory_space<vmem>>, %arg2: memref<5x8x72xf32, #tpu.memory_space<vmem>>, %arg3: memref<5x8x1xf32, #tpu.memory_space<vmem>>, %arg4: memref<5x8x1xf32, #tpu.memory_space<vmem>>, %arg5: memref<8x8xf32, #tpu.memory_space<vmem>>, %arg6: memref<8x1xf32, #tpu.memory_space<vmem>>, %arg7: memref<8x256xf32, #tpu.memory_space<vmem>>, %arg8: memref<1x1xf32, #tpu.memory_space<smem>>, %arg9: memref<2x1xf32, #tpu.memory_space<vmem>>) attributes {dimension_semantics = [], scalar_prefetch = 0 : i64, scratch_operands = 0 : i64, tpu.core_type = #tpu.core_type<tc>} {
    %c0 = arith.constant 0 : index
    %c0_0 = arith.constant 0 : index
    %c0_1 = arith.constant 0 : index
    %0 = vector.load %arg1[%c0, %c0_0, %c0_1] : memref<9x1x256xf32, #tpu.memory_space<vmem>>, vector<1x1x256xf32>
    %1 = vector.shape_cast %0 : vector<1x1x256xf32> to vector<1x256xf32>
    %2 = tpu.concatenate %1, %1 in 1 : vector<1x256xf32>, vector<1x256xf32> -> vector<1x512xf32>
    %c1 = arith.constant 1 : index
    %c0_2 = arith.constant 0 : index
    %c0_3 = arith.constant 0 : index
    %3 = vector.load %arg1[%c1, %c0_2, %c0_3] : memref<9x1x256xf32, #tpu.memory_space<vmem>>, vector<1x1x256xf32>
    %4 = vector.shape_cast %3 : vector<1x1x256xf32> to vector<1x256xf32>
    %5 = tpu.concatenate %4, %4 in 1 : vector<1x256xf32>, vector<1x256xf32> -> vector<1x512xf32>
    %c2 = arith.constant 2 : index
    %c0_4 = arith.constant 0 : index
    %c0_5 = arith.constant 0 : index
    %6 = vector.load %arg1[%c2, %c0_4, %c0_5] : memref<9x1x256xf32, #tpu.memory_space<vmem>>, vector<1x1x256xf32>
    %7 = vector.shape_cast %6 : vector<1x1x256xf32> to vector<1x256xf32>
    %8 = tpu.concatenate %7, %7 in 1 : vector<1x256xf32>, vector<1x256xf32> -> vector<1x512xf32>
    %c3 = arith.constant 3 : index
    %c0_6 = arith.constant 0 : index
    %c0_7 = arith.constant 0 : index
    %9 = vector.load %arg1[%c3, %c0_6, %c0_7] : memref<9x1x256xf32, #tpu.memory_space<vmem>>, vector<1x1x256xf32>
    %10 = vector.shape_cast %9 : vector<1x1x256xf32> to vector<1x256xf32>
    %11 = tpu.concatenate %10, %10 in 1 : vector<1x256xf32>, vector<1x256xf32> -> vector<1x512xf32>
    %c5 = arith.constant 5 : index
    %c0_8 = arith.constant 0 : index
    %c0_9 = arith.constant 0 : index
    %12 = vector.load %arg1[%c5, %c0_8, %c0_9] : memref<9x1x256xf32, #tpu.memory_space<vmem>>, vector<1x1x256xf32>
    %13 = vector.shape_cast %12 : vector<1x1x256xf32> to vector<1x256xf32>
    %14 = tpu.concatenate %13, %13 in 1 : vector<1x256xf32>, vector<1x256xf32> -> vector<1x512xf32>
    %c6 = arith.constant 6 : index
    %c0_10 = arith.constant 0 : index
    %c0_11 = arith.constant 0 : index
    %15 = vector.load %arg1[%c6, %c0_10, %c0_11] : memref<9x1x256xf32, #tpu.memory_space<vmem>>, vector<1x1x256xf32>
    %16 = vector.shape_cast %15 : vector<1x1x256xf32> to vector<1x256xf32>
    %17 = tpu.concatenate %16, %16 in 1 : vector<1x256xf32>, vector<1x256xf32> -> vector<1x512xf32>
    %c7 = arith.constant 7 : index
    %c0_12 = arith.constant 0 : index
    %c0_13 = arith.constant 0 : index
    %18 = vector.load %arg1[%c7, %c0_12, %c0_13] : memref<9x1x256xf32, #tpu.memory_space<vmem>>, vector<1x1x256xf32>
    %19 = vector.shape_cast %18 : vector<1x1x256xf32> to vector<1x256xf32>
    %20 = tpu.concatenate %19, %19 in 1 : vector<1x256xf32>, vector<1x256xf32> -> vector<1x512xf32>
    %c8 = arith.constant 8 : index
    %c0_14 = arith.constant 0 : index
    %c0_15 = arith.constant 0 : index
    %21 = vector.load %arg1[%c8, %c0_14, %c0_15] : memref<9x1x256xf32, #tpu.memory_space<vmem>>, vector<1x1x256xf32>
    %22 = vector.shape_cast %21 : vector<1x1x256xf32> to vector<1x256xf32>
    %23 = tpu.concatenate %22, %22 in 1 : vector<1x256xf32>, vector<1x256xf32> -> vector<1x512xf32>
    %c0_16 = arith.constant 0 : index
    %c0_17 = arith.constant 0 : index
    %24 = vector.load %arg0[%c0_16, %c0_17] : memref<8x512xf32, #tpu.memory_space<vmem>>, vector<8x512xf32>
    %c0_18 = arith.constant 0 : index
    %c0_19 = arith.constant 0 : index
    %c0_20 = arith.constant 0 : index
    %25 = vector.load %arg2[%c0_18, %c0_19, %c0_20] : memref<5x8x72xf32, #tpu.memory_space<vmem>>, vector<1x8x72xf32>
    %26 = vector.shape_cast %25 : vector<1x8x72xf32> to vector<8x72xf32>
    %c17_i32 = arith.constant 17 : i32
    %27 = tpu.dynamic_rotate %24 by %c17_i32 dim 1 : vector<8x512xf32>, i32 -> vector<8x512xf32>
    %28 = vector.broadcast %2 : vector<1x512xf32> to vector<8x512xf32>
    %29 = arith.mulf %27, %28 : vector<8x512xf32>
    %c16_i32 = arith.constant 16 : i32
    %30 = tpu.dynamic_rotate %24 by %c16_i32 dim 1 : vector<8x512xf32>, i32 -> vector<8x512xf32>
    %31 = vector.broadcast %5 : vector<1x512xf32> to vector<8x512xf32>
    %32 = arith.mulf %30, %31 : vector<8x512xf32>
    %c15_i32 = arith.constant 15 : i32
    %33 = tpu.dynamic_rotate %24 by %c15_i32 dim 1 : vector<8x512xf32>, i32 -> vector<8x512xf32>
    %34 = vector.broadcast %8 : vector<1x512xf32> to vector<8x512xf32>
    %35 = arith.mulf %33, %34 : vector<8x512xf32>
    %c1_i32 = arith.constant 1 : i32
    %36 = tpu.dynamic_rotate %24 by %c1_i32 dim 1 : vector<8x512xf32>, i32 -> vector<8x512xf32>
    %37 = vector.broadcast %11 : vector<1x512xf32> to vector<8x512xf32>
    %38 = arith.mulf %36, %37 : vector<8x512xf32>
    %c511_i32 = arith.constant 511 : i32
    %39 = tpu.dynamic_rotate %24 by %c511_i32 dim 1 : vector<8x512xf32>, i32 -> vector<8x512xf32>
    %40 = vector.broadcast %14 : vector<1x512xf32> to vector<8x512xf32>
    %41 = arith.mulf %39, %40 : vector<8x512xf32>
    %c497_i32 = arith.constant 497 : i32
    %42 = tpu.dynamic_rotate %24 by %c497_i32 dim 1 : vector<8x512xf32>, i32 -> vector<8x512xf32>
    %43 = vector.broadcast %17 : vector<1x512xf32> to vector<8x512xf32>
    %44 = arith.mulf %42, %43 : vector<8x512xf32>
    %c496_i32 = arith.constant 496 : i32
    %45 = tpu.dynamic_rotate %24 by %c496_i32 dim 1 : vector<8x512xf32>, i32 -> vector<8x512xf32>
    %46 = vector.broadcast %20 : vector<1x512xf32> to vector<8x512xf32>
    %47 = arith.mulf %45, %46 : vector<8x512xf32>
    %c495_i32 = arith.constant 495 : i32
    %48 = tpu.dynamic_rotate %24 by %c495_i32 dim 1 : vector<8x512xf32>, i32 -> vector<8x512xf32>
    %49 = vector.broadcast %23 : vector<1x512xf32> to vector<8x512xf32>
    %50 = arith.mulf %48, %49 : vector<8x512xf32>
    %51 = tpu.concatenate %29, %32, %35, %38, %24, %41, %44, %47, %50 in 0 : vector<8x512xf32>, vector<8x512xf32>, vector<8x512xf32>, vector<8x512xf32>, vector<8x512xf32>, vector<8x512xf32>, vector<8x512xf32>, vector<8x512xf32>, vector<8x512xf32> -> vector<72x512xf32>
    %cst = arith.constant dense<0.000000e+00> : vector<8x512xf32>
    %52 = tpu.matmul %26, %51, %cst {dimension_numbers = #tpu.dot_dimension_numbers<[1], [0], [0], [1], [0, 0, 1, 1], [], []>} : vector<8x72xf32>, vector<72x512xf32>, vector<8x512xf32> -> vector<8x512xf32>
    %c0_21 = arith.constant 0 : index
    %c0_22 = arith.constant 0 : index
    %c0_23 = arith.constant 0 : index
    %53 = vector.load %arg3[%c0_21, %c0_22, %c0_23] : memref<5x8x1xf32, #tpu.memory_space<vmem>>, vector<1x8x1xf32>
    %54 = vector.shape_cast %53 : vector<1x8x1xf32> to vector<8x1xf32>
    %c0_24 = arith.constant 0 : index
    %c0_25 = arith.constant 0 : index
    %c0_26 = arith.constant 0 : index
    %55 = vector.load %arg4[%c0_24, %c0_25, %c0_26] : memref<5x8x1xf32, #tpu.memory_space<vmem>>, vector<1x8x1xf32>
    %56 = vector.shape_cast %55 : vector<1x8x1xf32> to vector<8x1xf32>
    %cst_27 = arith.constant dense<0.000000e+00> : vector<8xf32>
    %57 = vector.multi_reduction <add>, %52, %cst_27 [1] : vector<8x512xf32> to vector<8xf32>
    %58 = vector.shape_cast %57 : vector<8xf32> to vector<8x1xf32>
    %59 = arith.mulf %52, %52 : vector<8x512xf32>
    %cst_28 = arith.constant dense<0.000000e+00> : vector<8xf32>
    %60 = vector.multi_reduction <add>, %59, %cst_28 [1] : vector<8x512xf32> to vector<8xf32>
    %61 = vector.shape_cast %60 : vector<8xf32> to vector<8x1xf32>
    %cst_29 = arith.constant 0.001953125 : f32
    %62 = vector.broadcast %cst_29 : f32 to vector<8x1xf32>
    %63 = arith.mulf %58, %62 : vector<8x1xf32>
    %cst_30 = arith.constant 0.001953125 : f32
    %64 = vector.broadcast %cst_30 : f32 to vector<8x1xf32>
    %65 = arith.mulf %61, %64 : vector<8x1xf32>
    %66 = arith.mulf %63, %63 : vector<8x1xf32>
    %67 = arith.subf %65, %66 : vector<8x1xf32>
    %68 = vector.broadcast %63 : vector<8x1xf32> to vector<8x512xf32>
    %69 = arith.subf %52, %68 : vector<8x512xf32>
    %cst_31 = arith.constant 9.99999974E-6 : f32
    %70 = vector.broadcast %cst_31 : f32 to vector<8x1xf32>
    %71 = arith.addf %67, %70 : vector<8x1xf32>
    %72 = math.rsqrt %71 : vector<8x1xf32>
    %73 = vector.broadcast %72 : vector<8x1xf32> to vector<8x512xf32>
    %74 = arith.mulf %69, %73 : vector<8x512xf32>
    %75 = vector.broadcast %54 : vector<8x1xf32> to vector<8x512xf32>
    %76 = arith.mulf %74, %75 : vector<8x512xf32>
    %77 = vector.broadcast %56 : vector<8x1xf32> to vector<8x512xf32>
    %78 = arith.addf %76, %77 : vector<8x512xf32>
    %cst_32 = arith.constant 0.000000e+00 : f32
    %79 = vector.broadcast %cst_32 : f32 to vector<8x512xf32>
    %80 = arith.maximumf %78, %79 : vector<8x512xf32>
    %c0_i32 = arith.constant 0 : i32
    %c2_i32 = arith.constant 2 : i32
    %81 = arith.addi %c0_i32, %c2_i32 : i32
    %c1_i32_33 = arith.constant 1 : i32
    %82 = scf.for %arg10 = %c0_i32 to %81 step %c1_i32_33 iter_args(%arg11 = %80) -> (vector<8x512xf32>)  : i32 {
      %c2_i32_50 = arith.constant 2 : i32
      %106 = arith.muli %c2_i32_50, %arg10 : i32
      %c1_i32_51 = arith.constant 1 : i32
      %107 = arith.addi %c1_i32_51, %106 : i32
      %c1_i32_52 = arith.constant 1 : i32
      %108 = arith.addi %107, %c1_i32_52 : i32
      %109 = arith.index_cast %107 : i32 to index
      %c0_53 = arith.constant 0 : index
      %c0_54 = arith.constant 0 : index
      %110 = vector.load %arg2[%109, %c0_53, %c0_54] : memref<5x8x72xf32, #tpu.memory_space<vmem>>, vector<1x8x72xf32>
      %111 = vector.shape_cast %110 : vector<1x8x72xf32> to vector<8x72xf32>
      %c17_i32_55 = arith.constant 17 : i32
      %112 = tpu.dynamic_rotate %arg11 by %c17_i32_55 dim 1 : vector<8x512xf32>, i32 -> vector<8x512xf32>
      %113 = vector.broadcast %2 : vector<1x512xf32> to vector<8x512xf32>
      %114 = arith.mulf %112, %113 : vector<8x512xf32>
      %c16_i32_56 = arith.constant 16 : i32
      %115 = tpu.dynamic_rotate %arg11 by %c16_i32_56 dim 1 : vector<8x512xf32>, i32 -> vector<8x512xf32>
      %116 = vector.broadcast %5 : vector<1x512xf32> to vector<8x512xf32>
      %117 = arith.mulf %115, %116 : vector<8x512xf32>
      %c15_i32_57 = arith.constant 15 : i32
      %118 = tpu.dynamic_rotate %arg11 by %c15_i32_57 dim 1 : vector<8x512xf32>, i32 -> vector<8x512xf32>
      %119 = vector.broadcast %8 : vector<1x512xf32> to vector<8x512xf32>
      %120 = arith.mulf %118, %119 : vector<8x512xf32>
      %c1_i32_58 = arith.constant 1 : i32
      %121 = tpu.dynamic_rotate %arg11 by %c1_i32_58 dim 1 : vector<8x512xf32>, i32 -> vector<8x512xf32>
      %122 = vector.broadcast %11 : vector<1x512xf32> to vector<8x512xf32>
      %123 = arith.mulf %121, %122 : vector<8x512xf32>
      %c511_i32_59 = arith.constant 511 : i32
      %124 = tpu.dynamic_rotate %arg11 by %c511_i32_59 dim 1 : vector<8x512xf32>, i32 -> vector<8x512xf32>
      %125 = vector.broadcast %14 : vector<1x512xf32> to vector<8x512xf32>
      %126 = arith.mulf %124, %125 : vector<8x512xf32>
      %c497_i32_60 = arith.constant 497 : i32
      %127 = tpu.dynamic_rotate %arg11 by %c497_i32_60 dim 1 : vector<8x512xf32>, i32 -> vector<8x512xf32>
      %128 = vector.broadcast %17 : vector<1x512xf32> to vector<8x512xf32>
      %129 = arith.mulf %127, %128 : vector<8x512xf32>
      %c496_i32_61 = arith.constant 496 : i32
      %130 = tpu.dynamic_rotate %arg11 by %c496_i32_61 dim 1 : vector<8x512xf32>, i32 -> vector<8x512xf32>
      %131 = vector.broadcast %20 : vector<1x512xf32> to vector<8x512xf32>
      %132 = arith.mulf %130, %131 : vector<8x512xf32>
      %c495_i32_62 = arith.constant 495 : i32
      %133 = tpu.dynamic_rotate %arg11 by %c495_i32_62 dim 1 : vector<8x512xf32>, i32 -> vector<8x512xf32>
      %134 = vector.broadcast %23 : vector<1x512xf32> to vector<8x512xf32>
      %135 = arith.mulf %133, %134 : vector<8x512xf32>
      %136 = tpu.concatenate %114, %117, %120, %123, %arg11, %126, %129, %132, %135 in 0 : vector<8x512xf32>, vector<8x512xf32>, vector<8x512xf32>, vector<8x512xf32>, vector<8x512xf32>, vector<8x512xf32>, vector<8x512xf32>, vector<8x512xf32>, vector<8x512xf32> -> vector<72x512xf32>
      %cst_63 = arith.constant dense<0.000000e+00> : vector<8x512xf32>
      %137 = tpu.matmul %111, %136, %cst_63 {dimension_numbers = #tpu.dot_dimension_numbers<[1], [0], [0], [1], [0, 0, 1, 1], [], []>} : vector<8x72xf32>, vector<72x512xf32>, vector<8x512xf32> -> vector<8x512xf32>
      %138 = arith.index_cast %107 : i32 to index
      %c0_64 = arith.constant 0 : index
      %c0_65 = arith.constant 0 : index
      %139 = vector.load %arg3[%138, %c0_64, %c0_65] : memref<5x8x1xf32, #tpu.memory_space<vmem>>, vector<1x8x1xf32>
      %140 = vector.shape_cast %139 : vector<1x8x1xf32> to vector<8x1xf32>
      %141 = arith.index_cast %107 : i32 to index
      %c0_66 = arith.constant 0 : index
      %c0_67 = arith.constant 0 : index
      %142 = vector.load %arg4[%141, %c0_66, %c0_67] : memref<5x8x1xf32, #tpu.memory_space<vmem>>, vector<1x8x1xf32>
      %143 = vector.shape_cast %142 : vector<1x8x1xf32> to vector<8x1xf32>
      %cst_68 = arith.constant dense<0.000000e+00> : vector<8xf32>
      %144 = vector.multi_reduction <add>, %137, %cst_68 [1] : vector<8x512xf32> to vector<8xf32>
      %145 = vector.shape_cast %144 : vector<8xf32> to vector<8x1xf32>
      %146 = arith.mulf %137, %137 : vector<8x512xf32>
      %cst_69 = arith.constant dense<0.000000e+00> : vector<8xf32>
      %147 = vector.multi_reduction <add>, %146, %cst_69 [1] : vector<8x512xf32> to vector<8xf32>
      %148 = vector.shape_cast %147 : vector<8xf32> to vector<8x1xf32>
      %cst_70 = arith.constant 0.001953125 : f32
      %149 = vector.broadcast %cst_70 : f32 to vector<8x1xf32>
      %150 = arith.mulf %145, %149 : vector<8x1xf32>
      %cst_71 = arith.constant 0.001953125 : f32
      %151 = vector.broadcast %cst_71 : f32 to vector<8x1xf32>
      %152 = arith.mulf %148, %151 : vector<8x1xf32>
      %153 = arith.mulf %150, %150 : vector<8x1xf32>
      %154 = arith.subf %152, %153 : vector<8x1xf32>
      %155 = vector.broadcast %150 : vector<8x1xf32> to vector<8x512xf32>
      %156 = arith.subf %137, %155 : vector<8x512xf32>
      %cst_72 = arith.constant 9.99999974E-6 : f32
      %157 = vector.broadcast %cst_72 : f32 to vector<8x1xf32>
      %158 = arith.addf %154, %157 : vector<8x1xf32>
      %159 = math.rsqrt %158 : vector<8x1xf32>
      %160 = vector.broadcast %159 : vector<8x1xf32> to vector<8x512xf32>
      %161 = arith.mulf %156, %160 : vector<8x512xf32>
      %162 = vector.broadcast %140 : vector<8x1xf32> to vector<8x512xf32>
      %163 = arith.mulf %161, %162 : vector<8x512xf32>
      %164 = vector.broadcast %143 : vector<8x1xf32> to vector<8x512xf32>
      %165 = arith.addf %163, %164 : vector<8x512xf32>
      %cst_73 = arith.constant 0.000000e+00 : f32
      %166 = vector.broadcast %cst_73 : f32 to vector<8x512xf32>
      %167 = arith.maximumf %165, %166 : vector<8x512xf32>
      %168 = arith.index_cast %108 : i32 to index
      %c0_74 = arith.constant 0 : index
      %c0_75 = arith.constant 0 : index
      %169 = vector.load %arg2[%168, %c0_74, %c0_75] : memref<5x8x72xf32, #tpu.memory_space<vmem>>, vector<1x8x72xf32>
      %170 = vector.shape_cast %169 : vector<1x8x72xf32> to vector<8x72xf32>
      %c17_i32_76 = arith.constant 17 : i32
      %171 = tpu.dynamic_rotate %167 by %c17_i32_76 dim 1 : vector<8x512xf32>, i32 -> vector<8x512xf32>
      %172 = vector.broadcast %2 : vector<1x512xf32> to vector<8x512xf32>
      %173 = arith.mulf %171, %172 : vector<8x512xf32>
      %c16_i32_77 = arith.constant 16 : i32
      %174 = tpu.dynamic_rotate %167 by %c16_i32_77 dim 1 : vector<8x512xf32>, i32 -> vector<8x512xf32>
      %175 = vector.broadcast %5 : vector<1x512xf32> to vector<8x512xf32>
      %176 = arith.mulf %174, %175 : vector<8x512xf32>
      %c15_i32_78 = arith.constant 15 : i32
      %177 = tpu.dynamic_rotate %167 by %c15_i32_78 dim 1 : vector<8x512xf32>, i32 -> vector<8x512xf32>
      %178 = vector.broadcast %8 : vector<1x512xf32> to vector<8x512xf32>
      %179 = arith.mulf %177, %178 : vector<8x512xf32>
      %c1_i32_79 = arith.constant 1 : i32
      %180 = tpu.dynamic_rotate %167 by %c1_i32_79 dim 1 : vector<8x512xf32>, i32 -> vector<8x512xf32>
      %181 = vector.broadcast %11 : vector<1x512xf32> to vector<8x512xf32>
      %182 = arith.mulf %180, %181 : vector<8x512xf32>
      %c511_i32_80 = arith.constant 511 : i32
      %183 = tpu.dynamic_rotate %167 by %c511_i32_80 dim 1 : vector<8x512xf32>, i32 -> vector<8x512xf32>
      %184 = vector.broadcast %14 : vector<1x512xf32> to vector<8x512xf32>
      %185 = arith.mulf %183, %184 : vector<8x512xf32>
      %c497_i32_81 = arith.constant 497 : i32
      %186 = tpu.dynamic_rotate %167 by %c497_i32_81 dim 1 : vector<8x512xf32>, i32 -> vector<8x512xf32>
      %187 = vector.broadcast %17 : vector<1x512xf32> to vector<8x512xf32>
      %188 = arith.mulf %186, %187 : vector<8x512xf32>
      %c496_i32_82 = arith.constant 496 : i32
      %189 = tpu.dynamic_rotate %167 by %c496_i32_82 dim 1 : vector<8x512xf32>, i32 -> vector<8x512xf32>
      %190 = vector.broadcast %20 : vector<1x512xf32> to vector<8x512xf32>
      %191 = arith.mulf %189, %190 : vector<8x512xf32>
      %c495_i32_83 = arith.constant 495 : i32
      %192 = tpu.dynamic_rotate %167 by %c495_i32_83 dim 1 : vector<8x512xf32>, i32 -> vector<8x512xf32>
      %193 = vector.broadcast %23 : vector<1x512xf32> to vector<8x512xf32>
      %194 = arith.mulf %192, %193 : vector<8x512xf32>
      %195 = tpu.concatenate %173, %176, %179, %182, %167, %185, %188, %191, %194 in 0 : vector<8x512xf32>, vector<8x512xf32>, vector<8x512xf32>, vector<8x512xf32>, vector<8x512xf32>, vector<8x512xf32>, vector<8x512xf32>, vector<8x512xf32>, vector<8x512xf32> -> vector<72x512xf32>
      %cst_84 = arith.constant dense<0.000000e+00> : vector<8x512xf32>
      %196 = tpu.matmul %170, %195, %cst_84 {dimension_numbers = #tpu.dot_dimension_numbers<[1], [0], [0], [1], [0, 0, 1, 1], [], []>} : vector<8x72xf32>, vector<72x512xf32>, vector<8x512xf32> -> vector<8x512xf32>
      %197 = arith.index_cast %108 : i32 to index
      %c0_85 = arith.constant 0 : index
      %c0_86 = arith.constant 0 : index
      %198 = vector.load %arg3[%197, %c0_85, %c0_86] : memref<5x8x1xf32, #tpu.memory_space<vmem>>, vector<1x8x1xf32>
      %199 = vector.shape_cast %198 : vector<1x8x1xf32> to vector<8x1xf32>
      %200 = arith.index_cast %108 : i32 to index
      %c0_87 = arith.constant 0 : index
      %c0_88 = arith.constant 0 : index
      %201 = vector.load %arg4[%200, %c0_87, %c0_88] : memref<5x8x1xf32, #tpu.memory_space<vmem>>, vector<1x8x1xf32>
      %202 = vector.shape_cast %201 : vector<1x8x1xf32> to vector<8x1xf32>
      %cst_89 = arith.constant dense<0.000000e+00> : vector<8xf32>
      %203 = vector.multi_reduction <add>, %196, %cst_89 [1] : vector<8x512xf32> to vector<8xf32>
      %204 = vector.shape_cast %203 : vector<8xf32> to vector<8x1xf32>
      %205 = arith.mulf %196, %196 : vector<8x512xf32>
      %cst_90 = arith.constant dense<0.000000e+00> : vector<8xf32>
      %206 = vector.multi_reduction <add>, %205, %cst_90 [1] : vector<8x512xf32> to vector<8xf32>
      %207 = vector.shape_cast %206 : vector<8xf32> to vector<8x1xf32>
      %cst_91 = arith.constant 0.001953125 : f32
      %208 = vector.broadcast %cst_91 : f32 to vector<8x1xf32>
      %209 = arith.mulf %204, %208 : vector<8x1xf32>
      %cst_92 = arith.constant 0.001953125 : f32
      %210 = vector.broadcast %cst_92 : f32 to vector<8x1xf32>
      %211 = arith.mulf %207, %210 : vector<8x1xf32>
      %212 = arith.mulf %209, %209 : vector<8x1xf32>
      %213 = arith.subf %211, %212 : vector<8x1xf32>
      %214 = vector.broadcast %209 : vector<8x1xf32> to vector<8x512xf32>
      %215 = arith.subf %196, %214 : vector<8x512xf32>
      %cst_93 = arith.constant 9.99999974E-6 : f32
      %216 = vector.broadcast %cst_93 : f32 to vector<8x1xf32>
      %217 = arith.addf %213, %216 : vector<8x1xf32>
      %218 = math.rsqrt %217 : vector<8x1xf32>
      %219 = vector.broadcast %218 : vector<8x1xf32> to vector<8x512xf32>
      %220 = arith.mulf %215, %219 : vector<8x512xf32>
      %221 = vector.broadcast %199 : vector<8x1xf32> to vector<8x512xf32>
      %222 = arith.mulf %220, %221 : vector<8x512xf32>
      %223 = vector.broadcast %202 : vector<8x1xf32> to vector<8x512xf32>
      %224 = arith.addf %222, %223 : vector<8x512xf32>
      %225 = arith.addf %224, %arg11 : vector<8x512xf32>
      %cst_94 = arith.constant 0.000000e+00 : f32
      %226 = vector.broadcast %cst_94 : f32 to vector<8x512xf32>
      %227 = arith.maximumf %225, %226 : vector<8x512xf32>
      scf.yield %227 : vector<8x512xf32>
    }
    %c2_i32_34 = arith.constant 2 : i32
    %c0_35 = arith.constant 0 : index
    %c0_36 = arith.constant 0 : index
    %83 = vector.load %arg5[%c0_35, %c0_36] : memref<8x8xf32, #tpu.memory_space<vmem>>, vector<8x8xf32>
    %cst_37 = arith.constant dense<0.000000e+00> : vector<8x512xf32>
    %84 = tpu.matmul %83, %82, %cst_37 {dimension_numbers = #tpu.dot_dimension_numbers<[1], [0], [0], [1], [0, 0, 1, 1], [], []>} : vector<8x8xf32>, vector<8x512xf32>, vector<8x512xf32> -> vector<8x512xf32>
    %c0_38 = arith.constant 0 : index
    %c0_39 = arith.constant 0 : index
    %85 = vector.load %arg6[%c0_38, %c0_39] : memref<8x1xf32, #tpu.memory_space<vmem>>, vector<8x1xf32>
    %86 = vector.broadcast %85 : vector<8x1xf32> to vector<8x512xf32>
    %87 = arith.addf %84, %86 : vector<8x512xf32>
    %c0_40 = arith.constant 0 : index
    %c0_41 = arith.constant 0 : index
    %88 = vector.load %arg7[%c0_40, %c0_41] : memref<8x256xf32, #tpu.memory_space<vmem>>, vector<8x256xf32>
    %89 = vector.extract_strided_slice %87 {offsets = [0, 0], sizes = [8, 256], strides = [1, 1]} : vector<8x512xf32> to vector<8x256xf32>
    %90 = arith.mulf %89, %88 : vector<8x256xf32>
    %cst_42 = arith.constant dense<0.000000e+00> : vector<8xf32>
    %91 = vector.multi_reduction <add>, %90, %cst_42 [1] : vector<8x256xf32> to vector<8xf32>
    %92 = vector.shape_cast %91 : vector<8xf32> to vector<8x1xf32>
    %cst_43 = arith.constant dense<0.000000e+00> : vector<1xf32>
    %93 = vector.multi_reduction <add>, %92, %cst_43 [0] : vector<8x1xf32> to vector<1xf32>
    %94 = vector.shape_cast %93 : vector<1xf32> to vector<1x1xf32>
    %95 = vector.extract_strided_slice %87 {offsets = [0, 256], sizes = [8, 256], strides = [1, 1]} : vector<8x512xf32> to vector<8x256xf32>
    %96 = arith.mulf %95, %88 : vector<8x256xf32>
    %cst_44 = arith.constant dense<0.000000e+00> : vector<8xf32>
    %97 = vector.multi_reduction <add>, %96, %cst_44 [1] : vector<8x256xf32> to vector<8xf32>
    %98 = vector.shape_cast %97 : vector<8xf32> to vector<8x1xf32>
    %cst_45 = arith.constant dense<0.000000e+00> : vector<1xf32>
    %99 = vector.multi_reduction <add>, %98, %cst_45 [0] : vector<8x1xf32> to vector<1xf32>
    %100 = vector.shape_cast %99 : vector<1xf32> to vector<1x1xf32>
    %101 = tpu.concatenate %94, %100 in 0 : vector<1x1xf32>, vector<1x1xf32> -> vector<2x1xf32>
    %c0_46 = arith.constant 0 : index
    %c0_47 = arith.constant 0 : index
    %102 = memref.load %arg8[%c0_46, %c0_47] : memref<1x1xf32, #tpu.memory_space<smem>>
    %103 = vector.broadcast %102 : f32 to vector<2x1xf32>
    %104 = arith.addf %101, %103 : vector<2x1xf32>
    %c0_48 = arith.constant 0 : index
    %c0_49 = arith.constant 0 : index
    %105 = vector.load %arg9[%c0_48, %c0_49] : memref<2x1xf32, #tpu.memory_space<vmem>>, vector<2x1xf32>
    tpu.vector_store %arg9[%c0_48, %c0_49], %104 {strides = array<i32>} : memref<2x1xf32, #tpu.memory_space<vmem>>, vector<2x1xf32>,
    return
  }
}

</mosaic_0001>

<bundles_post_ra>
// kernel: res_model_forward.1
= control target key start
LH: loop header
LB: loop body
LE: loop exit
PB: predicated region body
PF: predicated region fallthrough
CT: control target
= control target key end

     0   :  { %s1286_s13 = smov 112   ;;  %s1287_s14 = smov 111   ;;  %v101_v6 = vlaneseq  ;;  %vm247_vm8 = vcmask 588800   ;;  %s2029_s0 = inlined_call_operand.vmem [shape: f32[8,512], index: 0, kind: input, shape index: {}]   ;;  %s2030_s5 = inlined_call_operand.vmem [shape: f32[8,8], index: 5, kind: input, shape index: {}]   ;;  %s2031_s6 = inlined_call_operand.vmem [shape: f32[8,1], index: 6, kind: input, shape index: {}]   ;;  %s2032_s7 = inlined_call_operand.vmem [shape: f32[8,256], index: 7, kind: input, shape index: {}]   ;;  %s2033_s9 = inlined_call_operand.vmem [shape: f32[2,1], index: 9, kind: output, shape index: {}]   ;;  %s2034_s8 = inlined_call_operand.<no memory space> [shape: f32[1,1], index: 8, kind: input, shape index: {}]   ;;  %s2035_s1 = inlined_call_operand.vmem [shape: f32[9,1,256], index: 1, kind: input, shape index: {}]   ;;  %s2036_s2 = inlined_call_operand.vmem [shape: f32[5,8,72], index: 2, kind: input, shape index: {}]   ;;  %s2037_s3 = inlined_call_operand.vmem [shape: f32[5,8,1], index: 3, kind: input, shape index: {}]   ;;  %s2038_s4 = inlined_call_operand.vmem [shape: f32[5,8,1], index: 4, kind: input, shape index: {}]  }
   0x1   :  { %v1357_v0 = vld [vmem:[%s2029_s0 + $0x10] sm:$0xff]  ;;  %v1362_v1 = vld [vmem:[%s2029_s0] sm:$0xff]  ;;  %14 = sst [smem:[#allocation2]] %s2034_s8  ;;  %v1373_v2 = vld [vmem:[%s2029_s0 + $0x18] sm:$0xff]  ;;  %s1288_s19 = smov 113  }
   0x2   :  { %213 = vrot.lane.b32.xlu1 %v1357_v0, %s1286_s13  ;;  %232 = vrot.lane.b32.xlu0 %v1357_v0, %s1287_s14  ;;  %v1381_v3 = vld [vmem:[%s2029_s0 + $0x8] sm:$0xff]  ;;  %s1289_s8 = smov 127   ;;  %s1290_s0 = smov 1   ;;  %v1136_v7 = vld [vmem:[%s2035_s1 + $0x10] sm:$0x3]  ;;  %v1414_v9 = vand.u32 127, %v101_v6 }
   0x3   :  { %228 = vrot.lane.b32.xlu2 %v1362_v1, %s1287_s14  ;;  %s1291_s22 = smov 15   ;;  %s1292_s23 = smov 16   ;;  %v84_v8 = vperm.slane %v1136_v7, 0  ;;  %v85_v12 = vperm.slane %v1136_v7, 1  ;;  %v1135_v19 = vld [vmem:[%s2035_s1 + $0xe] sm:$0x3] }
   0x4   :  { %s1293_s24 = smov 17   ;;  %vm236_vm0 = vcmp.lt.s32.totalorder %v1414_v9, 111  ;;  %v77_v21 = vperm.slane %v1135_v19, 0  ;;  %vm217_vm1 = vcmp.lt.s32.totalorder %v1414_v9, 112  ;;  %v1134_v23 = vld [vmem:[%s2035_s1 + $0xc] sm:$0x3] }
   0x5   :  { %v1416_v10 = vperm.slane %v84_v8, 0  ;;  %v1422_v15 = vperm.slane %v85_v12, 0  ;;  %v70_v32 = vperm.slane %v1134_v23, 0  ;;  %v78_v33 = vperm.slane %v1135_v19, 1  ;;  %v1133_v38 = vld [vmem:[%s2035_s1 + $0xa] sm:$0x3] }
   0x6   :  { %v1434_v26 = vperm.slane %v77_v21, 0  ;;  %v71_v35 = vperm.slane %v1134_v23, 1  ;;  %vm198_vm2 = vcmp.lt.s32.totalorder %v1414_v9, 113  ;;  %v63_v48 = vperm.slane %v1133_v38, 0  ;;  %v1132_v57 = vld [vmem:[%s2035_s1 + $0x6] sm:$0x3] }
   0x7   :  { %v1446_v36 = vperm.slane %v70_v32, 0  ;;  %v1448_v37 = vperm.slane %v78_v33, 0  ;;  %vm179_vm3 = vcmp.lt.s32.totalorder %v1414_v9, 127  ;;  %v64_v56 = vperm.slane %v1133_v38, 1 }
   0x8   :  { %v1453_v41 = vperm.slane %v71_v35, 0  ;;  %v1466_v50 = vperm.slane %v63_v48, 0  ;;  %v56_v62 = vperm.slane %v1132_v57, 0  ;;  %vm160_vm4 = vcmp.lt.s32.totalorder %v1414_v9, 1 }
   0x9   :  { %v1478_v61 = vperm.slane %v64_v56, 0  ;;  %vm141_vm5 = vcmp.lt.s32.totalorder %v1414_v9, 15  ;;  %vm122_vm6 = vcmp.lt.s32.totalorder %v1414_v9, 16  ;;  %vm103_vm7 = vcmp.lt.s32.totalorder %v1414_v9, 17 }
   0xa   :  { %215 = vrot.lane.b32.xlu1 %v1373_v2, %s1286_s13  ;;  %234 = vrot.lane.b32.xlu0 %v1373_v2, %s1287_s14 }
   0xb   :  { %194 = vrot.lane.b32.xlu2 %v1357_v0, %s1288_s19 }
  0x12   :  { %196 = vrot.lane.b32.xlu0 %v1373_v2, %s1288_s19  ;;  %209 = vrot.lane.b32.xlu1 %v1362_v1, %s1286_s13 }
  0x13   :  { %230 = vrot.lane.b32.xlu2 %v1381_v3, %s1287_s14 }
  0x1a   :  { %175 = vrot.lane.b32.xlu0 %v1357_v0, %s1289_s8  ;;  %177 = vrot.lane.b32.xlu1 %v1373_v2, %s1289_s8 }
  0x1b   :  { %190 = vrot.lane.b32.xlu2 %v1362_v1, %s1288_s19 }
  0x22   :  { %211 = vrot.lane.b32.xlu0 %v1381_v3, %s1286_s13  ;;  %171 = vrot.lane.b32.xlu1 %v1362_v1, %s1289_s8 }
  0x23   :  { %192 = vrot.lane.b32.xlu2 %v1381_v3, %s1288_s19 }
  0x2a   :  { %154 = vrot.lane.b32.xlu0 %v1381_v3, %s1290_s0  ;;  %156 = vrot.lane.b32.xlu1 %v1357_v0, %s1290_s0 }
  0x2b   :  { %173 = vrot.lane.b32.xlu2 %v1381_v3, %s1289_s8 }
  0x32   :  { %135 = vrot.lane.b32.xlu0 %v1381_v3, %s1291_s22  ;;  %137 = vrot.lane.b32.xlu1 %v1357_v0, %s1291_s22 }
  0x33   :  { %158 = vrot.lane.b32.xlu2 %v1373_v2, %s1290_s0 }
  0x3a   :  { %116 = vrot.lane.b32.xlu0 %v1381_v3, %s1292_s23  ;;  %118 = vrot.lane.b32.xlu1 %v1357_v0, %s1292_s23 }
  0x3b   :  { %139 = vrot.lane.b32.xlu2 %v1373_v2, %s1291_s22 }
  0x42   :  { %152 = vrot.lane.b32.xlu0 %v1362_v1, %s1290_s0  ;;  %95 = vrot.lane.b32.xlu1 %v1381_v3, %s1293_s24 }
  0x43   :  { %97 = vrot.lane.b32.xlu2 %v1357_v0, %s1293_s24 }
  0x4a   :  { %120 = vrot.lane.b32.xlu0 %v1373_v2, %s1292_s23  ;;  %133 = vrot.lane.b32.xlu1 %v1362_v1, %s1291_s22 }
  0x4b   :  { %99 = vrot.lane.b32.xlu2 %v1373_v2, %s1293_s24 }
  0x52   :  { %114 = vrot.lane.b32.xlu0 %v1362_v1, %s1292_s23  ;;  %93 = vrot.lane.b32.xlu1 %v1362_v1, %s1293_s24  ;;  %s1602_s23 = smov 0  }
  0x5d   :  { %v229_v4 = vpop.permute.xlu2 %228 }
  0x65   :  { %v1409_v5 = vpop.permute.xlu2 %194 }
  0x6d   :  { %v231_v11 = vpop.permute.xlu2 %230 }
  0x6e   :  { %v239_v13 = vsel %vm236_vm0, %v229_v4, %v231_v11 }
  0x6f   :  { %v243_v14 = vmul.f32 %v1416_v10, %v239_v13 }
  0x71   :  { %258 = vmatpush.msra.mxu0 %v243_v14 }
  0x74   :  { %v214_v16 = vpop.permute.xlu1 %213  ;;  %v233_v17 = vpop.permute.xlu0 %232 }
  0x75   :  { %v238_v18 = vsel %vm236_vm0, %v231_v11, %v233_v17  ;;  %v191_v22 = vpop.permute.xlu2 %190  ;;  %v57_v11 = vperm.slane %v1132_v57, 1 }
  0x76   :  { %v244_v20 = vmul.f32 %v1422_v15, %v238_v18 }
  0x77   :  { %v1502_v21 = vperm.slane %v57_v11, 0 }
  0x78   :  { %278 = vmatpush.msra.mxu1 %v244_v20  ;;  %v1500_v20 = vperm.slane %v56_v62, 0 }
  0x7c   :  { %v216_v24 = vpop.permute.xlu1 %215  ;;  %v235_v25 = vpop.permute.xlu0 %234 }
  0x7d   :  { %v218_v27 = vsel %vm217_vm1, %v214_v16, %v216_v24  ;;  %v237_v28 = vsel %vm236_vm0, %v233_v17, %v235_v25  ;;  %v240_v29 = vsel %vm236_vm0, %v235_v25, %v229_v4  ;;  %v193_v45 = vpop.permute.xlu2 %192 }
  0x7e   :  { %v245_v30 = vmul.f32 %v1416_v10, %v237_v28  ;;  %v246_v31 = vmul.f32 %v1422_v15, %v240_v29  ;;  %v226_v34 = vmul.f32 %v1434_v26, %v218_v27  ;;  %v200_v58 = vsel %vm198_vm2, %v193_v45, %v1409_v5 }
  0x7f   :  { %v201_v63 = vsel %vm198_vm2, %v191_v22, %v193_v45 }
  0x80   :  { %298 = vmatpush.msra.mxu2 %v245_v30  ;;  %318 = vmatpush.msra.mxu3 %v246_v31  ;;  %v205_v14 = vmul.f32 %v1446_v36, %v201_v63  ;;  %v92_v63 = vld [vmem:[%s2036_s2] sm:$0xff] }
  0x82   :  { %299 = vmatpush.msra.mxu2 %v226_v34  ;;  %v1130_v34 = vld [vmem:[%s2035_s1 + $0x2] sm:$0x3] }
  0x83   :  { %v43_v62 = vperm.slane %v1130_v34, 1 }
  0x84   :  { %v197_v39 = vpop.permute.xlu0 %196  ;;  %v210_v40 = vpop.permute.xlu1 %209 }
  0x85   :  { %v199_v42 = vsel %vm198_vm2, %v1409_v5, %v197_v39  ;;  %v202_v43 = vsel %vm198_vm2, %v197_v39, %v191_v22  ;;  %v221_v44 = vsel %vm217_vm1, %v216_v24, %v210_v40  ;;  %v174_v55 = vpop.permute.xlu2 %173  ;;  %v1131_v22 = vld [vmem:[%s2035_s1 + $0x4] sm:$0x3] }
  0x86   :  { %v207_v46 = vmul.f32 %v1446_v36, %v199_v42  ;;  %v227_v47 = vmul.f32 %v1448_v37, %v221_v44  ;;  %v208_v49 = vmul.f32 %v1453_v41, %v202_v43  ;;  %v49_v30 = vperm.slane %v1131_v22, 0  ;;  %v33_v44 = vld [vmem:[%s2035_s1] sm:$0x3] }
  0x87   :  { %v42_v42 = vperm.slane %v1130_v34, 0  ;;  %v331_v34 = vld [vmem:[%s2037_s3] sm:$0xff] }
  0x88   :  { %300 = vmatpush.msra.mxu2 %v207_v46  ;;  %319 = vmatpush.msra.mxu3 %v227_v47  ;;  %v1517_v32 = vperm.slane %v49_v30, 0 }
  0x89   :  { %v1531_v43 = vperm.slane %v42_v42, 0 }
  0x8a   :  { %320 = vmatpush.msra.mxu3 %v208_v49  ;;  %v35_v49 = vperm.slane %v33_v44, 0 }
  0x8c   :  { %v176_v51 = vpop.permute.xlu0 %175  ;;  %v178_v52 = vpop.permute.xlu1 %177 }
  0x8d   :  { %v180_v53 = vsel %vm179_vm3, %v176_v51, %v178_v52  ;;  %v181_v12 = vsel %vm179_vm3, %v174_v55, %v176_v51  ;;  %v159_v17 = vpop.permute.xlu2 %158 }
  0x8e   :  { %v188_v54 = vmul.f32 %v1466_v50, %v180_v53  ;;  %v187_v19 = vmul.f32 %v1478_v61, %v181_v12 }
  0x90   :  { %301 = vmatpush.msra.mxu2 %v188_v54 }
  0x92   :  { %302 = vmatpush.msra.mxu2 %v1357_v0 }
  0x94   :  { %v212_v59 = vpop.permute.xlu0 %211  ;;  %v172_v60 = vpop.permute.xlu1 %171 }
  0x95   :  { %v219_v4 = vsel %vm217_vm1, %v212_v59, %v214_v16  ;;  %v220_v6 = vsel %vm217_vm1, %v210_v40, %v212_v59  ;;  %v183_v0 = vsel %vm179_vm3, %v178_v52, %v172_v60  ;;  %v182_v13 = vsel %vm179_vm3, %v172_v60, %v174_v55  ;;  %v140_v31 = vpop.permute.xlu2 %139 }
  0x96   :  { %v224_v7 = vmul.f32 %v1434_v26, %v220_v6  ;;  %v225_v5 = vmul.f32 %v1448_v37, %v219_v4  ;;  %v189_v8 = vmul.f32 %v1478_v61, %v183_v0  ;;  %v206_v16 = vmul.f32 %v1453_v41, %v200_v58 }
  0x97   :  { %v186_v18 = vmul.f32 %v1466_v50, %v182_v13  ;;  %v1540_v52 = vperm.slane %v35_v49, 0  ;;  %v36_v4 = vperm.slane %v33_v44, 1  ;;  %v1554_v6 = vperm.slane %v43_v62, 0 }
  0x98   :  { %259 = vmatpush.msra.mxu0 %v224_v7  ;;  %279 = vmatpush.msra.mxu1 %v225_v5 }
  0x99   :  { %321 = vmatpush.msra.mxu3 %v189_v8  ;;  %v1563_v13 = vperm.slane %v36_v4, 0 }
  0x9a   :  { %260 = vmatpush.msra.mxu0 %v205_v14  ;;  %280 = vmatpush.msra.mxu1 %v206_v16 }
  0x9b   :  { %322 = vmatpush.msra.mxu3 %v1373_v2  ;;  %v50_v2 = vperm.slane %v1131_v22, 1 }
  0x9c   :  { %v155_v23 = vpop.permute.xlu0 %154  ;;  %v157_v24 = vpop.permute.xlu1 %156  ;;  %261 = vmatpush.msra.mxu0 %v186_v18  ;;  %281 = vmatpush.msra.mxu1 %v187_v19 }
  0x9d   :  { %v162_v25 = vsel %vm160_vm4, %v155_v23, %v157_v24  ;;  %v161_v27 = vsel %vm160_vm4, %v157_v24, %v159_v17  ;;  %v1519_v33 = vperm.slane %v50_v2, 0  ;;  %v98_v51 = vpop.permute.xlu2 %97 }
  0x9e   :  { %v169_v28 = vmul.f32 %v1500_v20, %v162_v25  ;;  %v170_v29 = vmul.f32 %v1502_v21, %v161_v27  ;;  %262 = vmatpush.msra.mxu0 %v1362_v1  ;;  %282 = vmatpush.msra.mxu1 %v1381_v3 }
  0xa0   :  { %303 = vmatpush.msra.mxu2 %v169_v28  ;;  %323 = vmatpush.msra.mxu3 %v170_v29 }
  0xa4   :  { %v136_v35 = vpop.permute.xlu0 %135  ;;  %v138_v38 = vpop.permute.xlu1 %137 }
  0xa5   :  { %v143_v1 = vsel %vm141_vm5, %v136_v35, %v138_v38  ;;  %v142_v3 = vsel %vm141_vm5, %v138_v38, %v140_v31  ;;  %v100_v0 = vpop.permute.xlu2 %99  ;;  %v332_v38 = vld [vmem:[%s2038_s4] sm:$0xff] }
  0xa6   :  { %v150_v39 = vmul.f32 %v1517_v32, %v143_v1  ;;  %v151_v40 = vmul.f32 %v1519_v33, %v142_v3  ;;  %v104_v14 = vsel %vm103_vm7, %v98_v51, %v100_v0 }
  0xa7   :  { %v113_v19 = vmul.f32 %v1563_v13, %v104_v14 }
  0xa8   :  { %304 = vmatpush.msra.mxu2 %v150_v39  ;;  %324 = vmatpush.msra.mxu3 %v151_v40 }
  0xac   :  { %v117_v45 = vpop.permute.xlu0 %116  ;;  %v119_v46 = vpop.permute.xlu1 %118 }
  0xad   :  { %v124_v47 = vsel %vm122_vm6, %v117_v45, %v119_v46 }
  0xae   :  { %v131_v48 = vmul.f32 %v1531_v43, %v124_v47 }
  0xb0   :  { %305 = vmatpush.msra.mxu2 %v131_v48 }
  0xb4   :  { %v153_v53 = vpop.permute.xlu0 %152  ;;  %v96_v54 = vpop.permute.xlu1 %95 }
  0xb5   :  { %v163_v55 = vsel %vm160_vm4, %v153_v53, %v155_v23  ;;  %v164_v56 = vsel %vm160_vm4, %v159_v17, %v153_v53  ;;  %v105_v57 = vsel %vm103_vm7, %v96_v54, %v98_v51 }
  0xb6   :  { %v167_v58 = vmul.f32 %v1500_v20, %v164_v56  ;;  %v168_v59 = vmul.f32 %v1502_v21, %v163_v55  ;;  %v112_v60 = vmul.f32 %v1540_v52, %v105_v57 }
  0xb8   :  { %263 = vmatpush.msra.mxu0 %v167_v58  ;;  %283 = vmatpush.msra.mxu1 %v168_v59 }
  0xb9   :  { %306 = vmatpush.msra.mxu2 %v112_v60 }
  0xba   :  { %1139 = vmatmul.msk.f32.vlgmr.msra.gmra.mxu2 %vm247_vm8, %v92_v63 }
  0xbc   :  { %v121_v7 = vpop.permute.xlu0 %120  ;;  %v134_v5 = vpop.permute.xlu1 %133 }
  0xbd   :  { %v123_v8 = vsel %vm122_vm6, %v119_v46, %v121_v7  ;;  %v144_v11 = vsel %vm141_vm5, %v134_v5, %v136_v35  ;;  %v145_v12 = vsel %vm141_vm5, %v140_v31, %v134_v5  ;;  %v1294_v35 = vmov 0  }
  0xbe   :  { %v148_v16 = vmul.f32 %v1517_v32, %v145_v12  ;;  %v149_v17 = vmul.f32 %v1519_v33, %v144_v11  ;;  %v132_v18 = vmul.f32 %v1554_v6, %v123_v8  ;;  %1235 = vset.pattern.permute.xlu1 %v1294_v35  ;;  %1236 = vset.pattern.permute.xlu0 %v1294_v35 }
  0xbf   :  { %372 = vperm.xlu1 %1235, %v331_v34  }
  0xc0   :  { %264 = vmatpush.msra.mxu0 %v148_v16  ;;  %284 = vmatpush.msra.mxu1 %v149_v17 }
  0xc1   :  { %325 = vmatpush.msra.mxu3 %v132_v18 }
  0xc3   :  { %326 = vmatpush.msra.mxu3 %v113_v19 }
  0xc4   :  { %v115_v22 = vpop.permute.xlu0 %114  ;;  %v94_v23 = vpop.permute.xlu1 %93  ;;  %1140 = vmatmul.msk.f32.vlgmr.msra.gmra.mxu3 %vm247_vm8, %v92_v63 }
  0xc5   :  { %v125_v24 = vsel %vm122_vm6, %v115_v22, %v117_v45  ;;  %v126_v25 = vsel %vm122_vm6, %v121_v7, %v115_v22  ;;  %v106_v27 = vsel %vm103_vm7, %v94_v23, %v96_v54  ;;  %v107_v28 = vsel %vm103_vm7, %v100_v0, %v94_v23 }
  0xc6   :  { %v129_v29 = vmul.f32 %v1531_v43, %v126_v25  ;;  %v130_v30 = vmul.f32 %v1554_v6, %v125_v24  ;;  %v110_v2 = vmul.f32 %v1540_v52, %v107_v28  ;;  %v111_v31 = vmul.f32 %v1563_v13, %v106_v27 }
  0xc7   :  { %381 = vperm.xlu1 %1235, %v332_v38  }
  0xc8   :  { %265 = vmatpush.msra.mxu0 %v129_v29  ;;  %285 = vmatpush.msra.mxu1 %v130_v30 }
  0xca   :  { %266 = vmatpush.msra.mxu0 %v110_v2  ;;  %286 = vmatpush.msra.mxu1 %v111_v31 }
  0xcb   :  { %1137 = vmatmul.msk.f32.vlgmr.msra.gmra.mxu0 %vm247_vm8, %v92_v63  ;;  %1138 = vmatmul.msk.f32.vlgmr.msra.gmra.mxu1 %vm247_vm8, %v92_v63 }
 0x131   :  { %v373_v5 = vpop.permute.xlu1 %372 }
 0x139   :  { %v382_v30 = vpop.permute.xlu1 %381 }
 0x13d   :  { %v308_v1 = vpop.f32.mrf.mxu2 }
 0x13e   :  { %v340_v46 = vmul.f32 %v308_v1, %v308_v1 }
 0x147   :  { %v328_v3 = vpop.f32.mrf.mxu3 }
 0x148   :  { %v268_v39 = vpop.f32.mrf.mxu0  ;;  %v288_v40 = vpop.f32.mrf.mxu1  ;;  %v341_v49 = vmul.f32 %v328_v3, %v328_v3 }
 0x149   :  { %v338_v42 = vmul.f32 %v268_v39, %v268_v39  ;;  %v333_v44 = vadd.f32 %v288_v40, %v268_v39  ;;  %v339_v45 = vmul.f32 %v288_v40, %v288_v40 }
 0x14b   :  { %v342_v47 = vadd.f32 %v339_v45, %v338_v42  ;;  %v334_v48 = vadd.f32 %v333_v44, %v308_v1 }
 0x14d   :  { %v335_v51 = vadd.f32 %v334_v48, %v328_v3  ;;  %v343_v53 = vadd.f32 %v342_v47, %v340_v46 }
 0x14f   :  { %336 = vadd.xlane.f32.xlu2 %v335_v51  ;;  %v344_v54 = vadd.f32 %v343_v53, %v341_v49 }
 0x151   :  { %345 = vadd.xlane.f32.xlu0 %v344_v54 }
 0x1c2   :  { %v337_v55 = vpop.xlane.xlu2 %336 }
 0x1c3   :  { %v347_v56 = vmul.f32 0.001953125, %v337_v55 }
 0x1c4   :  { %v346_v57 = vpop.xlane.xlu0 %345 }
 0x1c5   :  { %v348_v58 = vmul.f32 0.001953125, %v346_v57  ;;  %v349_v59 = vmul.f32 %v347_v56, %v347_v56  ;;  %v351_v12 = vsub.f32 %v268_v39, %v347_v56  ;;  %v352_v14 = vsub.f32 %v288_v40, %v347_v56 }
 0x1c6   :  { %v353_v16 = vsub.f32 %v308_v1, %v347_v56  ;;  %v354_v17 = vsub.f32 %v328_v3, %v347_v56 }
 0x1c7   :  { %v350_v60 = vsub.f32 %v348_v58, %v349_v59 }
 0x1c9   :  { %v355_v62 = vadd.f32 1e-05, %v350_v60 }
 0x1cb   :  { %1237 = vrsqrt.f32 %v355_v62  ;;  %vm362_vm10 = vweird.f32 %v355_v62 }
 0x1d1   :  { %v1238_v63 = vpop.eup %1237 }
 0x1d2   :  { %v357_v4 = vmul.f32 %v1238_v63, %v355_v62  ;;  %vm363_vm9 = vweird.f32 %v1238_v63 }
 0x1d3   :  { %vm364_vm11 = vmor %vm362_vm10, %vm363_vm9 }
 0x1d4   :  { %v358_v0 = vmul.f32 %v1238_v63, %v357_v4 }
 0x1d6   :  { %v359_v7 = vmul.f32 0.5, %v358_v0 }
 0x1d8   :  { %v360_v8 = vsub.f32 1.5, %v359_v7 }
 0x1da   :  { %v361_v11 = vmul.f32 %v1238_v63, %v360_v8 }
 0x1dc   :  { %v365_v18 = vsel %vm364_vm11, %v1238_v63, %v361_v11 }
 0x1dd   :  { %v366_v19 = vmul.f32 %v365_v18, %v351_v12  ;;  %v367_v22 = vmul.f32 %v365_v18, %v352_v14  ;;  %v368_v23 = vmul.f32 %v365_v18, %v353_v16  ;;  %v369_v24 = vmul.f32 %v365_v18, %v354_v17 }
 0x1df   :  { %v375_v25 = vmul.f32 %v373_v5, %v366_v19  ;;  %v376_v27 = vmul.f32 %v373_v5, %v367_v22  ;;  %v377_v28 = vmul.f32 %v373_v5, %v368_v23  ;;  %v378_v29 = vmul.f32 %v373_v5, %v369_v24 }
 0x1e1   :  { %v384_v2 = vadd.f32 %v382_v30, %v375_v25  ;;  %v385_v31 = vadd.f32 %v382_v30, %v376_v27  ;;  %v386_v34 = vadd.f32 %v382_v30, %v377_v28  ;;  %v387_v38 = vadd.f32 %v382_v30, %v378_v29 }
 0x1e3   :  { %v388_v42 = vmax.f32 %v384_v2, 0.0   ;;  %v389_v44 = vmax.f32 %v385_v31, 0.0   ;;  %v390_v39 = vmax.f32 %v386_v34, 0.0   ;;  %v391_v40 = vmax.f32 %v387_v38, 0.0  }
 0x1e4 LB: > { %s1295_s24 = smov 112   ;;  %s1296_s25 = smov 111   ;;  %s1284_s23 = sphi %s1602_s23, %s397_s23   ;;  %v1280_v42 = vphi %v388_v42, %v2042_v42   ;;  %v1276_v44 = vphi %v389_v44, %v2041_v44   ;;  %v1272_v39 = vphi %v390_v39, %v2040_v39   ;;  %v1268_v40 = vphi %v391_v40, %v2039_v40  }
 0x1e5   : > { %508 = vrot.lane.b32.xlu1 %v1272_v39, %s1295_s24  ;;  %524 = vrot.lane.b32.xlu0 %v1272_v39, %s1296_s25  ;;  %s1297_s26 = smov 113   ;;  %s1298_s27 = smov 127  }
 0x1e6   : > { %520 = vrot.lane.b32.xlu2 %v1280_v42, %s1296_s25  ;;  %s1299_s28 = smov 1   ;;  %s1300_s29 = smov 15  }
 0x1e7   : > { %s1301_s30 = smov 16   ;;  %s1302_s10 = smov 17  }
 0x1e8   : > { %s1751_s11 = sshll.u32 %s1284_s23, 4  ;;  %s397_s23 = sadd.s32 1, %s1284_s23  }
 0x1e9   : > { %s1757_s14 = scalar_lea.vmem %s2036_s2, %s1751_s11  ;;  %s1801_s17 = scalar_lea.vmem %s2037_s3, %s1751_s11 }
 0x1ea   : > { %s1808_s1 = scalar_lea.vmem %s2038_s4, %s1751_s11  ;;  %p394_p0 = scmp.ge.s32.totalorder %s397_s23, 2  }
 0x1eb   :  { %vm970_vm11 = vcmask (%p394_p0), 64512  }
 0x1ed   : > { %510 = vrot.lane.b32.xlu1 %v1268_v40, %s1295_s24  ;;  %526 = vrot.lane.b32.xlu0 %v1268_v40, %s1296_s25 }
 0x1ee   : > { %492 = vrot.lane.b32.xlu2 %v1272_v39, %s1297_s26 }
 0x1f5   : > { %504 = vrot.lane.b32.xlu1 %v1280_v42, %s1295_s24  ;;  %494 = vrot.lane.b32.xlu0 %v1268_v40, %s1297_s26 }
 0x1f6   : > { %522 = vrot.lane.b32.xlu2 %v1276_v44, %s1296_s25 }
 0x1fd   : > { %478 = vrot.lane.b32.xlu1 %v1268_v40, %s1298_s27  ;;  %476 = vrot.lane.b32.xlu0 %v1272_v39, %s1298_s27 }
 0x1fe   : > { %488 = vrot.lane.b32.xlu2 %v1280_v42, %s1297_s26 }
 0x205   : > { %472 = vrot.lane.b32.xlu1 %v1280_v42, %s1298_s27  ;;  %506 = vrot.lane.b32.xlu0 %v1276_v44, %s1295_s24 }
 0x206   : > { %490 = vrot.lane.b32.xlu2 %v1276_v44, %s1297_s26 }
 0x20d   : > { %460 = vrot.lane.b32.xlu1 %v1272_v39, %s1299_s28  ;;  %458 = vrot.lane.b32.xlu0 %v1276_v44, %s1299_s28 }
 0x20e   : > { %474 = vrot.lane.b32.xlu2 %v1276_v44, %s1298_s27 }
 0x215   : > { %444 = vrot.lane.b32.xlu1 %v1272_v39, %s1300_s29  ;;  %442 = vrot.lane.b32.xlu0 %v1276_v44, %s1300_s29 }
 0x216   : > { %462 = vrot.lane.b32.xlu2 %v1268_v40, %s1299_s28 }
 0x21d   : > { %428 = vrot.lane.b32.xlu1 %v1272_v39, %s1301_s30  ;;  %426 = vrot.lane.b32.xlu0 %v1276_v44, %s1301_s30 }
 0x21e   : > { %446 = vrot.lane.b32.xlu2 %v1268_v40, %s1300_s29 }
 0x225   : > { %410 = vrot.lane.b32.xlu1 %v1276_v44, %s1302_s10  ;;  %456 = vrot.lane.b32.xlu0 %v1280_v42, %s1299_s28 }
 0x226   : > { %412 = vrot.lane.b32.xlu2 %v1272_v39, %s1302_s10 }
 0x22d   : > { %440 = vrot.lane.b32.xlu1 %v1280_v42, %s1300_s29  ;;  %430 = vrot.lane.b32.xlu0 %v1268_v40, %s1301_s30 }
 0x22e   : > { %414 = vrot.lane.b32.xlu2 %v1268_v40, %s1302_s10 }
 0x235   : > { %408 = vrot.lane.b32.xlu1 %v1280_v42, %s1302_s10  ;;  %424 = vrot.lane.b32.xlu0 %v1280_v42, %s1301_s30 }
 0x240   : > { %v521_v1 = vpop.permute.xlu2 %520 }
 0x248   : > { %v493_v3 = vpop.permute.xlu2 %492 }
 0x250   : > { %v523_v45 = vpop.permute.xlu2 %522 }
 0x251   : > { %v530_v46 = vsel %vm236_vm0, %v521_v1, %v523_v45 }
 0x252   : > { %v532_v47 = vmul.f32 %v530_v46, %v1416_v10 }
 0x254   : > { %546 = vmatpush.msra.mxu0 %v532_v47 }
 0x257   : > { %v509_v48 = vpop.permute.xlu1 %508  ;;  %v525_v49 = vpop.permute.xlu0 %524 }
 0x258   : > { %v529_v51 = vsel %vm236_vm0, %v523_v45, %v525_v49  ;;  %v489_v54 = vpop.permute.xlu2 %488 }
 0x259   : > { %v533_v53 = vmul.f32 %v529_v51, %v1422_v15 }
 0x25b   : > { %566 = vmatpush.msra.mxu1 %v533_v53 }
 0x25f   : > { %v511_v55 = vpop.permute.xlu1 %510  ;;  %v527_v56 = vpop.permute.xlu0 %526 }
 0x260   : > { %v528_v57 = vsel %vm236_vm0, %v525_v49, %v527_v56  ;;  %v531_v58 = vsel %vm236_vm0, %v527_v56, %v521_v1  ;;  %v512_v59 = vsel %vm217_vm1, %v509_v48, %v511_v55  ;;  %v491_v11 = vpop.permute.xlu2 %490 }
 0x261   : > { %v534_v60 = vmul.f32 %v528_v57, %v1416_v10  ;;  %v535_v62 = vmul.f32 %v531_v58, %v1422_v15  ;;  %v518_v63 = vmul.f32 %v512_v59, %v1434_v26  ;;  %v498_v27 = vsel %vm198_vm2, %v489_v54, %v491_v11 }
 0x262   : > { %v497_v2 = vsel %vm198_vm2, %v491_v11, %v493_v3  ;;  %v500_v46 = vmul.f32 %v498_v27, %v1446_v36 }
 0x263   : > { %586 = vmatpush.msra.mxu2 %v534_v60  ;;  %606 = vmatpush.msra.mxu3 %v535_v62  ;;  %v501_v47 = vmul.f32 %v497_v2, %v1453_v41 }
 0x265   : > { %587 = vmatpush.msra.mxu2 %v518_v63 }
 0x267   : > { %v505_v4 = vpop.permute.xlu1 %504  ;;  %v495_v0 = vpop.permute.xlu0 %494 }
 0x268   : > { %v496_v7 = vsel %vm198_vm2, %v493_v3, %v495_v0  ;;  %v515_v5 = vsel %vm217_vm1, %v511_v55, %v505_v4  ;;  %v499_v8 = vsel %vm198_vm2, %v495_v0, %v489_v54  ;;  %v475_v23 = vpop.permute.xlu2 %474 }
 0x269   : > { %v502_v12 = vmul.f32 %v496_v7, %v1446_v36  ;;  %v519_v14 = vmul.f32 %v515_v5, %v1448_v37  ;;  %v503_v16 = vmul.f32 %v499_v8, %v1453_v41 }
 0x26b   : > { %588 = vmatpush.msra.mxu2 %v502_v12  ;;  %607 = vmatpush.msra.mxu3 %v519_v14 }
 0x26d   : > { %608 = vmatpush.msra.mxu3 %v503_v16 }
 0x26f   : > { %v479_v17 = vpop.permute.xlu1 %478  ;;  %v477_v18 = vpop.permute.xlu0 %476 }
 0x270   : > { %v480_v19 = vsel %vm179_vm3, %v477_v18, %v479_v17  ;;  %v481_v45 = vsel %vm179_vm3, %v475_v23, %v477_v18 }
 0x271   : > { %v486_v22 = vmul.f32 %v480_v19, %v1466_v50  ;;  %v485_v49 = vmul.f32 %v481_v45, %v1478_v61 }
 0x273   : > { %589 = vmatpush.msra.mxu2 %v486_v22 }
 0x275   : > { %590 = vmatpush.msra.mxu2 %v1272_v39 }
 0x277   : > { %v473_v24 = vpop.permute.xlu1 %472  ;;  %v507_v25 = vpop.permute.xlu0 %506 }
 0x278   : > { %v514_v28 = vsel %vm217_vm1, %v505_v4, %v507_v25  ;;  %v513_v29 = vsel %vm217_vm1, %v507_v25, %v509_v48  ;;  %v483_v30 = vsel %vm179_vm3, %v479_v17, %v473_v24  ;;  %v482_v1 = vsel %vm179_vm3, %v473_v24, %v475_v23  ;;  %v463_v48 = vpop.permute.xlu2 %462  ;;  %v1143_v25 = vld [vmem:[%s1757_s14 + $0x8] sm:$0xff] }
 0x279   : > { %v516_v31 = vmul.f32 %v514_v28, %v1434_v26  ;;  %v517_v34 = vmul.f32 %v513_v29, %v1448_v37  ;;  %v487_v38 = vmul.f32 %v483_v30, %v1478_v61  ;;  %v484_v3 = vmul.f32 %v482_v1, %v1466_v50 }
 0x27b   : > { %547 = vmatpush.msra.mxu0 %v516_v31  ;;  %567 = vmatpush.msra.mxu1 %v517_v34 }
 0x27c   : > { %609 = vmatpush.msra.mxu3 %v487_v38 }
 0x27d   : > { %548 = vmatpush.msra.mxu0 %v500_v46  ;;  %568 = vmatpush.msra.mxu1 %v501_v47 }
 0x27e   : > { %610 = vmatpush.msra.mxu3 %v1268_v40 }
 0x27f   : > { %v461_v51 = vpop.permute.xlu1 %460  ;;  %549 = vmatpush.msra.mxu0 %v484_v3  ;;  %569 = vmatpush.msra.mxu1 %v485_v49  ;;  %v459_v53 = vpop.permute.xlu0 %458 }
 0x280   : > { %v465_v54 = vsel %vm160_vm4, %v459_v53, %v461_v51  ;;  %v464_v55 = vsel %vm160_vm4, %v461_v51, %v463_v48  ;;  %v447_v58 = vpop.permute.xlu2 %446 }
 0x281   : > { %v470_v56 = vmul.f32 %v465_v54, %v1500_v20  ;;  %v471_v57 = vmul.f32 %v464_v55, %v1502_v21  ;;  %550 = vmatpush.msra.mxu0 %v1280_v42  ;;  %570 = vmatpush.msra.mxu1 %v1276_v44 }
 0x283   : > { %591 = vmatpush.msra.mxu2 %v470_v56  ;;  %611 = vmatpush.msra.mxu3 %v471_v57 }
 0x287   : > { %v445_v59 = vpop.permute.xlu1 %444  ;;  %v443_v60 = vpop.permute.xlu0 %442 }
 0x288   : > { %v449_v62 = vsel %vm141_vm5, %v443_v60, %v445_v59  ;;  %v448_v63 = vsel %vm141_vm5, %v445_v59, %v447_v58  ;;  %v413_v12 = vpop.permute.xlu2 %412  ;;  %v1303_v59 = vmov 0  }
 0x289   : > { %v454_v4 = vmul.f32 %v449_v62, %v1517_v32  ;;  %v455_v0 = vmul.f32 %v448_v63, %v1519_v33  ;;  %1239 = vset.pattern.permute.xlu1 %v1303_v59  ;;  %1240 = vset.pattern.permute.xlu0 %v1303_v59 }
 0x28a   :  { %1245 = vset.pattern.permute.xlu0 (%p394_p0), %v1294_v35 }
 0x28b   : > { %592 = vmatpush.msra.mxu2 %v454_v4  ;;  %612 = vmatpush.msra.mxu3 %v455_v0 }
 0x28f   : > { %v429_v7 = vpop.permute.xlu1 %428  ;;  %v427_v5 = vpop.permute.xlu0 %426 }
 0x290   : > { %v433_v8 = vsel %vm122_vm6, %v427_v5, %v429_v7  ;;  %v415_v27 = vpop.permute.xlu2 %414 }
 0x291   : > { %v438_v11 = vmul.f32 %v433_v8, %v1531_v43  ;;  %v416_v45 = vsel %vm103_vm7, %v413_v12, %v415_v27 }
 0x292   : > { %v423_v46 = vmul.f32 %v416_v45, %v1563_v13 }
 0x293   : > { %593 = vmatpush.msra.mxu2 %v438_v11 }
 0x297   : > { %v411_v14 = vpop.permute.xlu1 %410  ;;  %v457_v16 = vpop.permute.xlu0 %456 }
 0x298   : > { %v467_v17 = vsel %vm160_vm4, %v463_v48, %v457_v16  ;;  %v466_v18 = vsel %vm160_vm4, %v457_v16, %v459_v53  ;;  %v417_v19 = vsel %vm103_vm7, %v411_v14, %v413_v12 }
 0x299   : > { %v468_v22 = vmul.f32 %v467_v17, %v1500_v20  ;;  %v469_v23 = vmul.f32 %v466_v18, %v1502_v21  ;;  %v422_v24 = vmul.f32 %v417_v19, %v1540_v52 }
 0x29b   : > { %551 = vmatpush.msra.mxu0 %v468_v22  ;;  %571 = vmatpush.msra.mxu1 %v469_v23 }
 0x29c   : > { %594 = vmatpush.msra.mxu2 %v422_v24 }
 0x29d   : > { %1146 = vmatmul.msk.f32.vlgmr.msra.gmra.mxu2 %vm247_vm8, %v1143_v25 }
 0x29f   : > { %v441_v28 = vpop.permute.xlu1 %440  ;;  %v431_v29 = vpop.permute.xlu0 %430 }
 0x2a0   : > { %v451_v30 = vsel %vm141_vm5, %v447_v58, %v441_v28  ;;  %v450_v2 = vsel %vm141_vm5, %v441_v28, %v443_v60  ;;  %v432_v31 = vsel %vm122_vm6, %v429_v7, %v431_v29  ;;  %v1150_v58 = vld [vmem:[%s1801_s17 + $0x8] sm:$0xff] }
 0x2a1   : > { %v452_v34 = vmul.f32 %v451_v30, %v1517_v32  ;;  %v453_v38 = vmul.f32 %v450_v2, %v1519_v33  ;;  %v439_v1 = vmul.f32 %v432_v31, %v1554_v6  ;;  %662 = vperm.xlu1 %1239, %v1150_v58   ;;  %v1153_v60 = vld [vmem:[%s1808_s1 + $0x8] sm:$0xff] }
 0x2a3   : > { %552 = vmatpush.msra.mxu0 %v452_v34  ;;  %572 = vmatpush.msra.mxu1 %v453_v38 }
 0x2a4   : > { %613 = vmatpush.msra.mxu3 %v439_v1 }
 0x2a6   : > { %614 = vmatpush.msra.mxu3 %v423_v46 }
 0x2a7   : > { %v409_v47 = vpop.permute.xlu1 %408  ;;  %v425_v48 = vpop.permute.xlu0 %424  ;;  %1147 = vmatmul.msk.f32.vlgmr.msra.gmra.mxu3 %vm247_vm8, %v1143_v25 }
 0x2a8   : > { %v435_v3 = vsel %vm122_vm6, %v431_v29, %v425_v48  ;;  %v434_v49 = vsel %vm122_vm6, %v425_v48, %v427_v5  ;;  %v419_v51 = vsel %vm103_vm7, %v415_v27, %v409_v47  ;;  %v418_v53 = vsel %vm103_vm7, %v409_v47, %v411_v14 }
 0x2a9   : > { %v436_v54 = vmul.f32 %v435_v3, %v1531_v43  ;;  %v437_v55 = vmul.f32 %v434_v49, %v1554_v6  ;;  %v420_v56 = vmul.f32 %v419_v51, %v1540_v52  ;;  %v421_v57 = vmul.f32 %v418_v53, %v1563_v13  ;;  %671 = vperm.xlu1 %1239, %v1153_v60  }
 0x2ab   : > { %553 = vmatpush.msra.mxu0 %v436_v54  ;;  %573 = vmatpush.msra.mxu1 %v437_v55 }
 0x2ad   : > { %554 = vmatpush.msra.mxu0 %v420_v56  ;;  %574 = vmatpush.msra.mxu1 %v421_v57 }
 0x2ae   : > { %1144 = vmatmul.msk.f32.vlgmr.msra.gmra.mxu0 %vm247_vm8, %v1143_v25  ;;  %1145 = vmatmul.msk.f32.vlgmr.msra.gmra.mxu1 %vm247_vm8, %v1143_v25 }
 0x313   : > { %v663_v38 = vpop.permute.xlu1 %662 }
 0x31b   : > { %v672_v56 = vpop.permute.xlu1 %671 }
 0x320   : > { %v596_v62 = vpop.f32.mrf.mxu2 }
 0x321   : > { %v630_v11 = vmul.f32 %v596_v62, %v596_v62 }
 0x32a   : > { %v616_v63 = vpop.f32.mrf.mxu3 }
 0x32b   : > { %v556_v4 = vpop.f32.mrf.mxu0  ;;  %v576_v0 = vpop.f32.mrf.mxu1  ;;  %v631_v14 = vmul.f32 %v616_v63, %v616_v63 }
 0x32c   : > { %v628_v7 = vmul.f32 %v556_v4, %v556_v4  ;;  %v623_v5 = vadd.f32 %v576_v0, %v556_v4  ;;  %v629_v8 = vmul.f32 %v576_v0, %v576_v0 }
 0x32e   : > { %v624_v12 = vadd.f32 %v623_v5, %v596_v62  ;;  %v632_v16 = vadd.f32 %v629_v8, %v628_v7 }
 0x330   : > { %v625_v17 = vadd.f32 %v624_v12, %v616_v63  ;;  %v633_v18 = vadd.f32 %v632_v16, %v630_v11  ;;  %v1163_v16 = vld [vmem:[%s1801_s17 + $0x10] sm:$0xff] }
 0x332   : > { %626 = vadd.xlane.f32.xlu2 %v625_v17  ;;  %v634_v19 = vadd.f32 %v633_v18, %v631_v14 }
 0x334   : > { %635 = vadd.xlane.f32.xlu0 %v634_v19 }
 0x3a5   : > { %v627_v22 = vpop.xlane.xlu2 %626 }
 0x3a6   : > { %v637_v23 = vmul.f32 0.001953125, %v627_v22 }
 0x3a7   : > { %v636_v24 = vpop.xlane.xlu0 %635 }
 0x3a8   : > { %v638_v25 = vmul.f32 0.001953125, %v636_v24  ;;  %v639_v27 = vmul.f32 %v637_v23, %v637_v23  ;;  %v643_v46 = vsub.f32 %v596_v62, %v637_v23  ;;  %v644_v47 = vsub.f32 %v616_v63, %v637_v23  ;;  %v1166_v24 = vld [vmem:[%s1808_s1 + $0x10] sm:$0xff] }
 0x3a9   : > { %v642_v3 = vsub.f32 %v576_v0, %v637_v23  ;;  %v641_v5 = vsub.f32 %v556_v4, %v637_v23 }
 0x3aa   : > { %v640_v28 = vsub.f32 %v638_v25, %v639_v27 }
 0x3ac   : > { %v645_v29 = vadd.f32 1e-05, %v640_v28 }
 0x3ae   : > { %1241 = vrsqrt.f32 %v645_v29  ;;  %vm652_vm13 = vweird.f32 %v645_v29 }
 0x3b4   : > { %v1242_v30 = vpop.eup %1241 }
 0x3b5   : > { %v647_v2 = vmul.f32 %v1242_v30, %v645_v29  ;;  %vm653_vm12 = vweird.f32 %v1242_v30 }
 0x3b6   : > { %vm654_vm14 = vmor %vm652_vm13, %vm653_vm12 }
 0x3b7   : > { %v648_v31 = vmul.f32 %v1242_v30, %v647_v2 }
 0x3b9   : > { %v649_v34 = vmul.f32 0.5, %v648_v31 }
 0x3bb   : > { %v650_v1 = vsub.f32 1.5, %v649_v34 }
 0x3bd   : > { %v651_v45 = vmul.f32 %v1242_v30, %v650_v1 }
 0x3bf   : > { %v655_v48 = vsel %vm654_vm14, %v1242_v30, %v651_v45 }
 0x3c0   : > { %v658_v49 = vmul.f32 %v655_v48, %v643_v46  ;;  %v659_v51 = vmul.f32 %v655_v48, %v644_v47  ;;  %v657_v53 = vmul.f32 %v655_v48, %v642_v3  ;;  %v656_v62 = vmul.f32 %v655_v48, %v641_v5 }
 0x3c2   : > { %v667_v54 = vmul.f32 %v663_v38, %v658_v49  ;;  %v668_v55 = vmul.f32 %v663_v38, %v659_v51  ;;  %v666_v59 = vmul.f32 %v663_v38, %v657_v53  ;;  %v665_v0 = vmul.f32 %v663_v38, %v656_v62 }
 0x3c4   : > { %v676_v57 = vadd.f32 %v672_v56, %v667_v54  ;;  %v677_v58 = vadd.f32 %v672_v56, %v668_v55  ;;  %v675_v63 = vadd.f32 %v672_v56, %v666_v59  ;;  %v674_v4 = vadd.f32 %v672_v56, %v665_v0 }
 0x3c6   : > { %v1811_v60 = vmax.f32 %v676_v57, 0.0  ;;  %v1813_v7 = vmax.f32 %v677_v58, 0.0  ;;  %v1821_v8 = vmax.f32 %v675_v63, 0.0  ;;  %v1829_v11 = vmax.f32 %v674_v4, 0.0 }
 0x3c8   : > { %787 = vrot.lane.b32.xlu2 %v1813_v7, %s1295_s24  ;;  %769 = vrot.lane.b32.xlu0 %v1811_v60, %s1297_s26 }
 0x3c9   : > { %801 = vrot.lane.b32.xlu1 %v1811_v60, %s1296_s25 }
 0x3d0   : > { %753 = vrot.lane.b32.xlu0 %v1811_v60, %s1298_s27  ;;  %799 = vrot.lane.b32.xlu2 %v1821_v8, %s1296_s25 }
 0x3d1   : > { %803 = vrot.lane.b32.xlu1 %v1813_v7, %s1296_s25 }
 0x3d8   : > { %783 = vrot.lane.b32.xlu0 %v1821_v8, %s1295_s24  ;;  %765 = vrot.lane.b32.xlu2 %v1829_v11, %s1297_s26 }
 0x3d9   : > { %785 = vrot.lane.b32.xlu1 %v1811_v60, %s1295_s24 }
 0x3e0   : > { %735 = vrot.lane.b32.xlu0 %v1821_v8, %s1299_s28  ;;  %767 = vrot.lane.b32.xlu2 %v1821_v8, %s1297_s26 }
 0x3e1   : > { %797 = vrot.lane.b32.xlu1 %v1829_v11, %s1296_s25 }
 0x3e8   : > { %719 = vrot.lane.b32.xlu0 %v1821_v8, %s1300_s29  ;;  %751 = vrot.lane.b32.xlu2 %v1821_v8, %s1298_s27 }
 0x3e9   : > { %771 = vrot.lane.b32.xlu1 %v1813_v7, %s1297_s26 }
 0x3f0   : > { %703 = vrot.lane.b32.xlu0 %v1821_v8, %s1301_s30  ;;  %739 = vrot.lane.b32.xlu2 %v1813_v7, %s1299_s28 }
 0x3f1   : > { %781 = vrot.lane.b32.xlu1 %v1829_v11, %s1295_s24 }
 0x3f8   : > { %733 = vrot.lane.b32.xlu0 %v1829_v11, %s1299_s28  ;;  %723 = vrot.lane.b32.xlu2 %v1813_v7, %s1300_s29 }
 0x3f9   : > { %755 = vrot.lane.b32.xlu1 %v1813_v7, %s1298_s27 }
 0x400   : > { %707 = vrot.lane.b32.xlu0 %v1813_v7, %s1301_s30  ;;  %689 = vrot.lane.b32.xlu2 %v1811_v60, %s1302_s10 }
 0x401   : > { %749 = vrot.lane.b32.xlu1 %v1829_v11, %s1298_s27 }
 0x408   : > { %701 = vrot.lane.b32.xlu0 %v1829_v11, %s1301_s30  ;;  %691 = vrot.lane.b32.xlu2 %v1813_v7, %s1302_s10 }
 0x409   : > { %737 = vrot.lane.b32.xlu1 %v1811_v60, %s1299_s28 }
 0x411   : > { %721 = vrot.lane.b32.xlu1 %v1811_v60, %s1300_s29 }
 0x419   : > { %705 = vrot.lane.b32.xlu1 %v1811_v60, %s1301_s30 }
 0x421   : > { %687 = vrot.lane.b32.xlu1 %v1821_v8, %s1302_s10 }
 0x422   : > { %v788_v12 = vpop.permute.xlu2 %787 }
 0x429   : > { %717 = vrot.lane.b32.xlu1 %v1829_v11, %s1300_s29 }
 0x42a   : > { %v800_v14 = vpop.permute.xlu2 %799 }
 0x431   : > { %685 = vrot.lane.b32.xlu1 %v1829_v11, %s1302_s10 }
 0x432   : > { %v766_v17 = vpop.permute.xlu2 %765 }
 0x439   : > { %939 = vperm.xlu1 %1239, %v1163_v16  }
 0x43a   : > { %v770_v18 = vpop.permute.xlu0 %769  ;;  %v768_v25 = vpop.permute.xlu2 %767 }
 0x43b   : > { %v802_v19 = vpop.permute.xlu1 %801  ;;  %v774_v45 = vsel %vm198_vm2, %v768_v25, %v770_v18 }
 0x43c   : > { %v806_v22 = vsel %vm236_vm0, %v800_v14, %v802_v19  ;;  %v778_v3 = vmul.f32 %v774_v45, %v1453_v41 }
 0x43d   : > { %v810_v23 = vmul.f32 %v806_v22, %v1422_v15 }
 0x43f   : > { %843 = vmatpush.msrb.mxu1 %v810_v23 }
 0x441   : > { %948 = vperm.xlu1 %1239, %v1166_v24  }
 0x442   : > { %v754_v27 = vpop.permute.xlu0 %753  ;;  %v752_v31 = vpop.permute.xlu2 %751 }
 0x443   : > { %v804_v28 = vpop.permute.xlu1 %803  ;;  %v758_v48 = vsel %vm179_vm3, %v752_v31, %v754_v27 }
 0x444   : > { %v805_v29 = vsel %vm236_vm0, %v802_v19, %v804_v28  ;;  %v762_v49 = vmul.f32 %v758_v48, %v1478_v61 }
 0x445   : > { %v811_v30 = vmul.f32 %v805_v29, %v1416_v10 }
 0x447   : > { %863 = vmatpush.msrb.mxu2 %v811_v30 }
 0x44a   : > { %v784_v2 = vpop.permute.xlu0 %783 }
 0x44b   : > { %v786_v34 = vpop.permute.xlu1 %785 }
 0x44c   : > { %v790_v38 = vsel %vm217_vm1, %v784_v2, %v786_v34  ;;  %v789_v1 = vsel %vm217_vm1, %v786_v34, %v788_v12 }
 0x44d   : > { %v794_v46 = vmul.f32 %v790_v38, %v1448_v37  ;;  %v795_v47 = vmul.f32 %v789_v1, %v1434_v26 }
 0x44f   : > { %844 = vmatpush.msrb.mxu1 %v794_v46  ;;  %864 = vmatpush.msrb.mxu2 %v795_v47 }
 0x451   : > { %845 = vmatpush.msrb.mxu1 %v778_v3 }
 0x452   : > { %v736_v51 = vpop.permute.xlu0 %735 }
 0x453   : > { %846 = vmatpush.msrb.mxu1 %v762_v49  ;;  %v798_v53 = vpop.permute.xlu1 %797 }
 0x454   : > { %v807_v54 = vsel %vm236_vm0, %v798_v53, %v800_v14  ;;  %v808_v55 = vsel %vm236_vm0, %v804_v28, %v798_v53  ;;  %v775_v14 = vsel %vm198_vm2, %v766_v17, %v768_v25  ;;  %vm1078_vm0 = vcmask (%p394_p0), 1040384  }
 0x455   : > { %847 = vmatpush.msrb.mxu1 %v1821_v8  ;;  %v809_v56 = vmul.f32 %v807_v54, %v1416_v10  ;;  %v812_v57 = vmul.f32 %v808_v55, %v1422_v15  ;;  %v777_v22 = vmul.f32 %v775_v14, %v1446_v36  ;;  %v1054_v15 = vld [vmem:[%s2032_s7] sm:$0xff] (%p394_p0) }
 0x457   : > { %823 = vmatpush.msrb.mxu0 %v809_v56  ;;  %883 = vmatpush.msrb.mxu3 %v812_v57 }
 0x45a   : > { %v1910_v58 = vpop.permute.xlu0 %719 }
 0x45b   : > { %v772_v59 = vpop.permute.xlu1 %771 }
 0x45c   : > { %v773_v5 = vsel %vm198_vm2, %v770_v18, %v772_v59  ;;  %v776_v16 = vsel %vm198_vm2, %v772_v59, %v766_v17 }
 0x45d   : > { %v779_v62 = vmul.f32 %v773_v5, %v1446_v36  ;;  %v780_v23 = vmul.f32 %v776_v16, %v1453_v41  ;;  %v1156_v16 = vld [vmem:[%s1757_s14 + $0x10] sm:$0xff]  ;;  %v1055_v36 = vld [vmem:[%s2032_s7 + $0x8] sm:$0xff] (%p394_p0) }
 0x45f   : > { %865 = vmatpush.msrb.mxu2 %v779_v62 }
 0x462   : > { %v1915_v63 = vpop.permute.xlu0 %703 }
 0x463   : > { %v782_v0 = vpop.permute.xlu1 %781 }
 0x464   : > { %v791_v8 = vsel %vm217_vm1, %v782_v0, %v784_v2  ;;  %v792_v4 = vsel %vm217_vm1, %v788_v12, %v782_v0  ;;  %v740_v12 = vpop.permute.xlu2 %739  ;;  %vm1083_vm1 = vcmask (%p394_p0), 1024  }
 0x465   : > { %v793_v18 = vmul.f32 %v791_v8, %v1434_v26  ;;  %v796_v19 = vmul.f32 %v792_v4, %v1448_v37 }
 0x467   : > { %824 = vmatpush.msrb.mxu0 %v793_v18  ;;  %884 = vmatpush.msrb.mxu3 %v796_v19 }
 0x469   : > { %825 = vmatpush.msrb.mxu0 %v777_v22  ;;  %885 = vmatpush.msrb.mxu3 %v780_v23 }
 0x46a   : > { %v734_v24 = vpop.permute.xlu0 %733 }
 0x46b   : > { %v756_v28 = vpop.permute.xlu1 %755  ;;  %v743_v25 = vsel %vm160_vm4, %v734_v24, %v736_v51 }
 0x46c   : > { %v746_v17 = vmul.f32 %v743_v25, %v1502_v21  ;;  %v757_v29 = vsel %vm179_vm3, %v754_v27, %v756_v28  ;;  %v724_v1 = vpop.permute.xlu2 %723  ;;  %v744_v27 = vsel %vm160_vm4, %v740_v12, %v734_v24 }
 0x46d   : > { %v763_v30 = vmul.f32 %v757_v29, %v1466_v50 }
 0x46e   : > { %848 = vmatpush.msrb.mxu1 %v746_v17 }
 0x46f   : > { %866 = vmatpush.msrb.mxu2 %v763_v30 }
 0x471   : > { %867 = vmatpush.msrb.mxu2 %v1811_v60  ;;  %v745_v60 = vmul.f32 %v744_v27, %v1500_v20 }
 0x472   : > { %v708_v57 = vpop.permute.xlu0 %707 }
 0x473   : > { %v750_v2 = vpop.permute.xlu1 %749 }
 0x474   : > { %v759_v34 = vsel %vm179_vm3, %v750_v2, %v752_v31  ;;  %v760_v38 = vsel %vm179_vm3, %v756_v28, %v750_v2  ;;  %v690_v53 = vpop.permute.xlu2 %689 }
 0x475   : > { %v761_v45 = vmul.f32 %v759_v34, %v1466_v50  ;;  %v764_v46 = vmul.f32 %v760_v38, %v1478_v61 }
 0x477   : > { %826 = vmatpush.msrb.mxu0 %v761_v45  ;;  %886 = vmatpush.msrb.mxu3 %v764_v46 }
 0x479   : > { %827 = vmatpush.msrb.mxu0 %v1829_v11  ;;  %887 = vmatpush.msrb.mxu3 %v1813_v7 }
 0x47a   : > { %v702_v23 = vpop.permute.xlu0 %701 }
 0x47b   : > { %828 = vmatpush.msrb.mxu0 %v745_v60  ;;  %v738_v31 = vpop.permute.xlu1 %737  ;;  %v712_v25 = vsel %vm122_vm6, %v708_v57, %v702_v23  ;;  %v711_v17 = vsel %vm122_vm6, %v702_v23, %v1915_v63 }
 0x47c   : > { %v742_v47 = vsel %vm160_vm4, %v736_v51, %v738_v31  ;;  %v741_v48 = vsel %vm160_vm4, %v738_v31, %v740_v12  ;;  %v692_v56 = vpop.permute.xlu2 %691  ;;  %v713_v2 = vmul.f32 %v712_v25, %v1531_v43  ;;  %v714_v34 = vmul.f32 %v711_v17, %v1554_v6 }
 0x47d   : > { %v747_v3 = vmul.f32 %v742_v47, %v1500_v20  ;;  %v748_v49 = vmul.f32 %v741_v48, %v1502_v21  ;;  %v693_v0 = vsel %vm103_vm7, %v690_v53, %v692_v56 }
 0x47e   : > { %v700_v14 = vmul.f32 %v693_v0, %v1563_v13 }
 0x47f   : > { %868 = vmatpush.msrb.mxu2 %v747_v3  ;;  %888 = vmatpush.msrb.mxu3 %v748_v49 }
 0x483   : > { %v722_v11 = vpop.permute.xlu1 %721 }
 0x484   : > { %v726_v7 = vsel %vm141_vm5, %v1910_v58, %v722_v11  ;;  %v725_v54 = vsel %vm141_vm5, %v722_v11, %v724_v1 }
 0x485   : > { %v731_v51 = vmul.f32 %v726_v7, %v1517_v32  ;;  %v732_v55 = vmul.f32 %v725_v54, %v1519_v33 }
 0x487   : > { %869 = vmatpush.msrb.mxu2 %v731_v51  ;;  %889 = vmatpush.msrb.mxu3 %v732_v55 }
 0x48b   : > { %v706_v59 = vpop.permute.xlu1 %705 }
 0x48c   : > { %v710_v5 = vsel %vm122_vm6, %v1915_v63, %v706_v59  ;;  %v709_v62 = vsel %vm122_vm6, %v706_v59, %v708_v57 }
 0x48d   : > { %v715_v8 = vmul.f32 %v710_v5, %v1531_v43  ;;  %v716_v4 = vmul.f32 %v709_v62, %v1554_v6 }
 0x48f   : > { %870 = vmatpush.msrb.mxu2 %v715_v8  ;;  %890 = vmatpush.msrb.mxu3 %v716_v4 }
 0x491   : > { %891 = vmatpush.msrb.mxu3 %v700_v14 }
 0x492   : > { %1160 = vmatmul.msk.f32.vlgmr.msrb.gmra.mxu3 %vm247_vm8, %v1156_v16 }
 0x493   : > { %v688_v18 = vpop.permute.xlu1 %687 }
 0x494   : > { %v694_v19 = vsel %vm103_vm7, %v688_v18, %v690_v53 }
 0x495   : > { %v699_v22 = vmul.f32 %v694_v19, %v1540_v52 }
 0x497   : > { %871 = vmatpush.msrb.mxu2 %v699_v22 }
 0x498   : > { %1159 = vmatmul.msk.f32.vlgmr.msrb.gmra.mxu2 %vm247_vm8, %v1156_v16 }
 0x49b   : > { %v718_v24 = vpop.permute.xlu1 %717 }
 0x49c   : > { %v728_v12 = vsel %vm141_vm5, %v724_v1, %v718_v24  ;;  %v727_v28 = vsel %vm141_vm5, %v718_v24, %v1910_v58 }
 0x49d   : > { %v729_v29 = vmul.f32 %v728_v12, %v1517_v32  ;;  %v730_v30 = vmul.f32 %v727_v28, %v1519_v33 }
 0x49f   : > { %829 = vmatpush.msrb.mxu0 %v729_v29  ;;  %849 = vmatpush.msrb.mxu1 %v730_v30 }
 0x4a1   : > { %830 = vmatpush.msrb.mxu0 %v713_v2  ;;  %850 = vmatpush.msrb.mxu1 %v714_v34 }
 0x4a3   : > { %v686_v58 = vpop.permute.xlu1 %685 }
 0x4a4   : > { %v696_v38 = vsel %vm103_vm7, %v692_v56, %v686_v58  ;;  %v695_v1 = vsel %vm103_vm7, %v686_v58, %v688_v18 }
 0x4a5   : > { %v697_v63 = vmul.f32 %v696_v38, %v1540_v52  ;;  %v698_v45 = vmul.f32 %v695_v1, %v1563_v13 }
 0x4a7   : > { %831 = vmatpush.msrb.mxu0 %v697_v63  ;;  %851 = vmatpush.msrb.mxu1 %v698_v45 }
 0x4a8   : > { %1157 = vmatmul.msk.f32.vlgmr.msrb.gmra.mxu0 %vm247_vm8, %v1156_v16  ;;  %1158 = vmatmul.msk.f32.vlgmr.msrb.gmra.mxu1 %vm247_vm8, %v1156_v16 }
 0x4ab   : > { %v940_v18 = vpop.permute.xlu1 %939 }
 0x4b3   : > { %v949_v45 = vpop.permute.xlu1 %948 }
 0x515   : > { %v893_v27 = vpop.f32.mrf.mxu3 }
 0x516   : > { %v908_v7 = vmul.f32 %v893_v27, %v893_v27 }
 0x51b   : > { %v873_v46 = vpop.f32.mrf.mxu2 }
 0x51c   : > { %v907_v49 = vmul.f32 %v873_v46, %v873_v46 }
 0x525   : > { %v833_v60 = vpop.f32.mrf.mxu0  ;;  %v853_v31 = vpop.f32.mrf.mxu1 }
 0x526   : > { %v905_v47 = vmul.f32 %v833_v60, %v833_v60  ;;  %v900_v48 = vadd.f32 %v853_v31, %v833_v60  ;;  %v906_v3 = vmul.f32 %v853_v31, %v853_v31 }
 0x528   : > { %v909_v53 = vadd.f32 %v906_v3, %v905_v47  ;;  %v901_v11 = vadd.f32 %v900_v48, %v873_v46 }
 0x52a   : > { %v902_v54 = vadd.f32 %v901_v11, %v893_v27  ;;  %v910_v51 = vadd.f32 %v909_v53, %v907_v49 }
 0x52c   : > { %903 = vadd.xlane.f32.xlu2 %v902_v54  ;;  %v911_v55 = vadd.f32 %v910_v51, %v908_v7  ;;  %v964_v51 = vld [vmem:[%s2031_s6] sm:$0xff] (%p394_p0)  ;;  %s1080_s6 = sld [smem:[#allocation2]] (%p394_p0) }
 0x52e   : > { %912 = vadd.xlane.f32.xlu0 %v911_v55 }
 0x542   :  { %967 = vperm.xlu0 (%p394_p0), %1245, %v964_v51  }
 0x59f   : > { %v904_v56 = vpop.xlane.xlu2 %903 }
 0x5a0   : > { %v914_v57 = vmul.f32 0.001953125, %v904_v56 }
 0x5a1   : > { %v913_v59 = vpop.xlane.xlu0 %912 }
 0x5a2   : > { %v915_v5 = vmul.f32 0.001953125, %v913_v59  ;;  %v916_v62 = vmul.f32 %v914_v57, %v914_v57  ;;  %v918_v24 = vsub.f32 %v833_v60, %v914_v57  ;;  %v919_v12 = vsub.f32 %v853_v31, %v914_v57 }
 0x5a3   : > { %v920_v28 = vsub.f32 %v873_v46, %v914_v57  ;;  %v921_v25 = vsub.f32 %v893_v27, %v914_v57 }
 0x5a4   : > { %v917_v0 = vsub.f32 %v915_v5, %v916_v62 }
 0x5a6   : > { %v922_v8 = vadd.f32 1e-05, %v917_v0 }
 0x5a8   : > { %1243 = vrsqrt.f32 %v922_v8  ;;  %vm929_vm9 = vweird.f32 %v922_v8 }
 0x5ae   : > { %v1244_v4 = vpop.eup %1243 }
 0x5af   : > { %v924_v14 = vmul.f32 %v1244_v4, %v922_v8  ;;  %vm930_vm15 = vweird.f32 %v1244_v4 }
 0x5b0   : > { %vm931_vm10 = vmor %vm929_vm9, %vm930_vm15 }
 0x5b1   : > { %v925_v16 = vmul.f32 %v1244_v4, %v924_v14  ;;  %v1081_v14 = vstv (%p394_p0), %s1080_s6 }
 0x5b3   : > { %v926_v19 = vmul.f32 0.5, %v925_v16 }
 0x5b4   :  { %v968_v9 = vpop.permute.xlu0 (%p394_p0), %967 }
 0x5b5   : > { %v927_v22 = vsub.f32 1.5, %v926_v19 }
 0x5b7   : > { %v928_v23 = vmul.f32 %v1244_v4, %v927_v22 }
 0x5b9   : > { %v932_v17 = vsel %vm931_vm10, %v1244_v4, %v928_v23 }
 0x5ba   : > { %v933_v29 = vmul.f32 %v932_v17, %v918_v24  ;;  %v934_v30 = vmul.f32 %v932_v17, %v919_v12  ;;  %v935_v2 = vmul.f32 %v932_v17, %v920_v28  ;;  %v936_v34 = vmul.f32 %v932_v17, %v921_v25 }
 0x5bc   : > { %v942_v58 = vmul.f32 %v940_v18, %v933_v29  ;;  %v943_v38 = vmul.f32 %v940_v18, %v934_v30  ;;  %v944_v1 = vmul.f32 %v940_v18, %v935_v2  ;;  %v945_v63 = vmul.f32 %v940_v18, %v936_v34 }
 0x5be   : > { %v951_v47 = vadd.f32 %v949_v45, %v942_v58  ;;  %v952_v48 = vadd.f32 %v949_v45, %v943_v38  ;;  %v953_v3 = vadd.f32 %v949_v45, %v944_v1  ;;  %v954_v49 = vadd.f32 %v949_v45, %v945_v63 }
 0x5c0   : > { %v955_v60 = vadd.f32 %v1280_v42, %v951_v47  ;;  %v956_v46 = vadd.f32 %v1276_v44, %v952_v48  ;;  %v957_v27 = vadd.f32 %v1272_v39, %v953_v3  ;;  %v958_v31 = vadd.f32 %v1268_v40, %v954_v49  ;;  %396 = sbr.rel (!%p394_p0) target bundleno = 484 (0x1e4), region = 76 }
 0x5c2   : > { %v959_v53 = vmax.f32 %v955_v60, 0.0   ;;  %v960_v11 = vmax.f32 %v956_v46, 0.0   ;;  %v961_v7 = vmax.f32 %v957_v27, 0.0   ;;  %v962_v54 = vmax.f32 %v958_v31, 0.0  }
 0x5c4   : > { %v2039_v40 = vmov %v962_v54  ;;  %v2040_v39 = vmov %v961_v7  ;;  %v2041_v44 = vmov %v960_v11  ;;  %v2042_v42 = vmov %v959_v53  ;;  %989 = vmatpush.msra.mxu0 (%p394_p0), %v959_v53  ;;  %1009 = vmatpush.msra.mxu1 (%p394_p0), %v960_v11 }
 0x5c5   :  { %v963_v42 = vld [vmem:[%s2030_s5] sm:$0xff]  ;;  %1029 = vmatpush.msra.mxu2 %v961_v7  ;;  %1049 = vmatpush.msra.mxu3 %v962_v54 }
 0x5c6   :  { %1167 = vmatmul.msk.f32.vlgmr.msra.gmra.mxu0 %vm970_vm11, %v963_v42  ;;  %1168 = vmatmul.msk.f32.vlgmr.msra.gmra.mxu1 %vm970_vm11, %v963_v42 }
 0x5c7   :  { %1169 = vmatmul.msk.f32.vlgmr.msra.gmra.mxu2 %vm970_vm11, %v963_v42  ;;  %1170 = vmatmul.msk.f32.vlgmr.msra.gmra.mxu3 %vm970_vm11, %v963_v42 }
 0x643   :  { %v991_v10 = vpop.f32.mrf.mxu0  ;;  %v1011_v26 = vpop.f32.mrf.mxu1 }
 0x644   :  { %v992_v37 = vadd.f32 %v991_v10, %v968_v9  ;;  %v1012_v41 = vadd.f32 %v1011_v26, %v968_v9 }
 0x646   :  { %v1056_v50 = vmul.f32 %v1054_v15, %v992_v37  ;;  %v1057_v61 = vmul.f32 %v1055_v36, %v1012_v41 }
 0x648   :  { %v1058_v20 = vadd.f32 %v1057_v61, %v1056_v50 }
 0x64a   :  { %v1031_v21 = vpop.f32.mrf.mxu2  ;;  %v1051_v32 = vpop.f32.mrf.mxu3  ;;  %1059 = vadd.xlane.f32.xlu0 %v1058_v20 }
 0x64b   :  { %v1032_v33 = vadd.f32 %v1031_v21, %v968_v9  ;;  %v1052_v43 = vadd.f32 %v1051_v32, %v968_v9 }
 0x64d   :  { %v1067_v52 = vmul.f32 %v1054_v15, %v1032_v33  ;;  %v1068_v6 = vmul.f32 %v1055_v36, %v1052_v43 }
 0x64f   :  { %v1069_v13 = vadd.f32 %v1068_v6, %v1067_v52 }
 0x651   :  { %1070 = vadd.xlane.f32.xlu1 %v1069_v13 }
 0x6bd   :  { %v1060_v35 = vpop.xlane.xlu0 %1059 }
 0x6be   :  { %v1061_v44 = vrot.slane %v1060_v35, 4 }
 0x6c0   :  { %v1062_v39 = vadd.f32 %v1061_v44, %v1060_v35 }
 0x6c2   :  { %v1063_v40 = vrot.slane %v1062_v39, 2 }
 0x6c4   :  { %v1071_v55 = vpop.xlane.xlu1 %1070  ;;  %v1064_v57 = vadd.f32 %v1063_v40, %v1062_v39 }
 0x6c5   :  { %v1072_v56 = vrot.slane %v1071_v55, 4 }
 0x6c6   :  { %v1065_v62 = vrot.slane %v1064_v57, 1 }
 0x6c7   :  { %v1073_v59 = vadd.f32 %v1072_v56, %v1071_v55 }
 0x6c8   :  { %v1066_v4 = vadd.f32 %v1065_v62, %v1064_v57 }
 0x6c9   :  { %v1074_v5 = vrot.slane %v1073_v59, 2 }
 0x6cb   :  { %v1075_v0 = vadd.f32 %v1074_v5, %v1073_v59 }
 0x6cd   :  { %v1076_v8 = vrot.slane %v1075_v0, 1 }
 0x6cf   :  { %v1077_v16 = vadd.f32 %v1076_v8, %v1075_v0 }
 0x6d1   :  { %v1079_v18 = vsel %vm1078_vm0, %v1066_v4, %v1077_v16 }
 0x6d2   :  { %v1082_v19 = vadd.f32 %v1081_v14, %v1079_v18 }
 0x6d4   :  { %1084 = vst.msk [vmem:[%s2033_s9] sm:$0x3] %vm1083_vm1, %v1082_v19 }

</bundles_post_ra>
